<compile_context>
chip_gen: v6e
topology: v6e:2x2x1
jax: 0.10.0
libtpu: 0.0.40
codegen_flags: <defaults>
</compile_context>

<pallas_src>
import functools
import math

import jax
import jax.numpy as jnp
from jax.experimental import pallas as pl
from jax.experimental.pallas import tpu as pltpu

H1, H2, H3 = 512, 256, 128
LANE = 128


def _round_up(x, m):
    return ((x + m - 1) // m) * m


# --------------------------------------------------------------------------
# Kernel
# --------------------------------------------------------------------------
def mlp_kernel(x_ref, w1_ref, b1_ref, w2_ref, b2_ref,
               w3_ref, b3_ref, w4_ref, b4_ref, o_ref):
    # bf16 MXU matmuls, f32 accumulation; bias + ReLU in f32; intermediate
    # activations recast to bf16 to feed the next bf16 matmul.
    h = jnp.dot(x_ref[...], w1_ref[...],
                preferred_element_type=jnp.float32) + b1_ref[...]
    h = jnp.maximum(h, 0.0).astype(jnp.bfloat16)           # relu(fc1(x))
    h = jnp.dot(h, w2_ref[...],
                preferred_element_type=jnp.float32) + b2_ref[...]
    h = jnp.maximum(h, 0.0).astype(jnp.bfloat16)           # relu(fc2(x))
    h = jnp.dot(h, w3_ref[...],
                preferred_element_type=jnp.float32) + b3_ref[...]
    h = jnp.maximum(h, 0.0).astype(jnp.bfloat16)           # relu(fc3(x)); 2nd relu no-op
    out = jnp.dot(h, w4_ref[...],
                  preferred_element_type=jnp.float32) + b4_ref[...]
    o_ref[...] = out.astype(o_ref.dtype)                    # fc4, stored as bf16


# --------------------------------------------------------------------------
# One-time parameter preparation (cast + pad) -- call ONCE, reuse every step.
# --------------------------------------------------------------------------
def prepare_params(params, dim_in):
    """Cast weights to bf16 and pad to MXU/lane-friendly shapes. Do once."""
    w1, b1, w2, b2, w3, b3, w4, b4 = params
    dim_out = w4.shape[1]
    din_p = _round_up(dim_in, LANE)
    dout_p = _round_up(dim_out, LANE)

    w1_p = jnp.zeros((din_p, H1), jnp.bfloat16).at[:dim_in, :].set(
        w1.astype(jnp.bfloat16))
    w2_b = w2.astype(jnp.bfloat16)
    w3_b = w3.astype(jnp.bfloat16)
    w4_p = jnp.zeros((H3, dout_p), jnp.bfloat16).at[:, :dim_out].set(
        w4.astype(jnp.bfloat16))

    b1r = b1.reshape(1, -1).astype(jnp.float32)
    b2r = b2.reshape(1, -1).astype(jnp.float32)
    b3r = b3.reshape(1, -1).astype(jnp.float32)
    b4_p = jnp.zeros((1, dout_p), jnp.float32).at[:, :dim_out].set(
        b4.reshape(1, -1).astype(jnp.float32))

    return (w1_p, b1r, w2_b, b2r, w3_b, b3r, w4_p, b4_p)


def _choose_tile(n, tm):
    """Batch tile: multiple of 16 rows (bf16 sublane packing); >=2 grid steps
    whenever the batch allows so the parallel axis shards across v7x's 2 TCs."""
    tm = max(16, _round_up(tm, 16))
    n_p16 = _round_up(n, 16)
    TM = min(tm, n_p16)
    if n_p16 // TM < 2 and n_p16 >= 32:
        TM = _round_up((n_p16 + 1) // 2, 16)
    n_p = _round_up(n_p16, TM)
    return TM, n_p


# --------------------------------------------------------------------------
# Forward (jitted; the pallas_call is the only per-call cost)
# --------------------------------------------------------------------------
@functools.partial(jax.jit, static_argnames=("dim_out", "tm"))
def mlp_forward(x_nchw, prepped_params, *, dim_out, tm=1024):
    """x_nchw: (N, C, H, W) float32. Returns (N, dim_out) float32."""
    w1_p, b1r, w2_b, b2r, w3_b, b3r, w4_p, b4_p = prepped_params
    N = x_nchw.shape[0]
    dim_in = x_nchw.shape[1] * x_nchw.shape[-2] * x_nchw.shape[-1]
    din_p = w1_p.shape[0]
    dout_p = w4_p.shape[1]

    TM, n_p = _choose_tile(N, tm)
    grid = (n_p // TM,)

    # x: cast to bf16; pad only if actually needed (fuses into one pass under jit).
    xf = x_nchw.reshape(N, dim_in).astype(jnp.bfloat16)
    if n_p != N or din_p != dim_in:
        xf = jnp.pad(xf, ((0, n_p - N), (0, din_p - dim_in)))

    def resident(shape):
        nd = len(shape)
        # Same block every grid step -> stays resident in VMEM.
        return pl.BlockSpec(shape, lambda *_: (0,) * nd)

    flops = 2 * n_p * (din_p * H1 + H1 * H2 + H2 * H3 + H3 * dout_p)
    bytes_accessed = (
        n_p * din_p * 2                                           # bf16 x
        + (w1_p.size + w2_b.size + w3_b.size + w4_p.size) * 2     # bf16 weights
        + (b1r.size + b2r.size + b3r.size + b4_p.size) * 4        # f32 biases
        + n_p * dout_p * 2                                        # bf16 out
    )

    # Rough double-buffered VMEM working set; raise the scoped limit only when
    # a very large tile needs it (e.g. v5e's 16 MiB default).
    vmem_est = (
        2 * TM * din_p * 2                      # x tile, 2 buffers, bf16
        + 2 * TM * dout_p * 2                   # out tile, 2 buffers, bf16
        + 2 * 2 * (din_p * H1 + H1 * H2 + H2 * H3 + H3 * dout_p)  # weights x2 bufs
        + TM * (H1 + H2 + H3) * (4 + 2)         # f32 acc + bf16 copies
        + TM * dout_p * 4
    )
    cp_kwargs = dict(dimension_semantics=("parallel",))
    if vmem_est > 15 * 1024 * 1024:
        cp_kwargs["vmem_limit_bytes"] = min(int(vmem_est * 5 // 4),
                                            48 * 1024 * 1024)

    out_p = pl.pallas_call(
        mlp_kernel,
        out_shape=jax.ShapeDtypeStruct((n_p, dout_p), jnp.bfloat16),
        grid=grid,
        in_specs=[
            pl.BlockSpec((TM, din_p), lambda i: (i, 0)),   # x: tiled over batch
            resident(w1_p.shape), resident(b1r.shape),
            resident(w2_b.shape), resident(b2r.shape),
            resident(w3_b.shape), resident(b3r.shape),
            resident(w4_p.shape), resident(b4_p.shape),
        ],
        out_specs=pl.BlockSpec((TM, dout_p), lambda i: (i, 0)),
        compiler_params=pltpu.CompilerParams(**cp_kwargs),
        cost_estimate=pl.CostEstimate(
            flops=flops, transcendentals=0, bytes_accessed=bytes_accessed),
    )(xf, w1_p, b1r, w2_b, b2r, w3_b, b3r, w4_p, b4_p)

    # Slice off padding, return f32 (module semantics).
    return out_p[:N, :dim_out].astype(jnp.float32)


# --------------------------------------------------------------------------
# Init / test
# --------------------------------------------------------------------------
def init_linear(key, fan_in, fan_out):
    # torch.nn.Linear default init: U(-1/sqrt(fan_in), 1/sqrt(fan_in)).
    kw, kb = jax.random.split(key)
    bound = 1.0 / math.sqrt(fan_in)
    w = jax.random.uniform(kw, (fan_in, fan_out), jnp.float32, -bound, bound)
    b = jax.random.uniform(kb, (fan_out,), jnp.float32, -bound, bound)
    return w, b


if __name__ == "__main__":
    key = jax.random.PRNGKey(0)
    kx, k1, k2, k3, k4 = jax.random.split(key, 5)

    # Small NCHW input: batch=2, channels=4, spatial=16x16 -> dim_in=1024, dim_out=10.
    N, C, H, W = 2, 4, 16, 16
    dim_in = C * H * W
    dim_out = 10

    x = jax.random.normal(kx, (N, C, H, W), jnp.float32)

    w1, b1 = init_linear(k1, dim_in, H1)
    w2, b2 = init_linear(k2, H1, H2)
    w3, b3 = init_linear(k3, H2, H3)
    w4, b4 = init_linear(k4, H3, dim_out)
    params = (w1, b1, w2, b2, w3, b3, w4, b4)

    # One-time param prep (cast/pad hoisted out of the per-call path).
    prepped = prepare_params(params, dim_in)
    prepped = jax.block_until_ready(prepped)

    out = mlp_forward(x, prepped, dim_out=dim_out)
    out = jax.block_until_ready(out)
    assert out.shape == (N, dim_out)

    # Reference 1: mimic the kernel's bf16/f32 mixed precision + bf16 output.
    xf = x.reshape(N, dim_in)
    hb = xf.astype(jnp.bfloat16)
    hb = jnp.maximum(jnp.dot(hb, w1.astype(jnp.bfloat16),
                             preferred_element_type=jnp.float32) + b1, 0.0).astype(jnp.bfloat16)
    hb = jnp.maximum(jnp.dot(hb, w2.astype(jnp.bfloat16),
                             preferred_element_type=jnp.float32) + b2, 0.0).astype(jnp.bfloat16)
    hb = jnp.maximum(jnp.dot(hb, w3.astype(jnp.bfloat16),
                             preferred_element_type=jnp.float32) + b3, 0.0).astype(jnp.bfloat16)
    ref_bf16 = (jnp.dot(hb, w4.astype(jnp.bfloat16),
                        preferred_element_type=jnp.float32) + b4)
    ref_bf16 = ref_bf16.astype(jnp.bfloat16).astype(jnp.float32)
    assert jnp.allclose(out, ref_bf16, atol=2e-2, rtol=2e-2)

    # Reference 2: pure-f32 module semantics (loose tolerance for bf16 compute).
    ref = jnp.maximum(xf @ w1 + b1, 0.0)
    ref = jnp.maximum(ref @ w2 + b2, 0.0)
    ref = jnp.maximum(ref @ w3 + b3, 0.0)
    ref = jnp.maximum(ref, 0.0) @ w4 + b4
    assert jnp.allclose(out, ref, atol=5e-2, rtol=5e-2)

    print("KERNEL_OK")
</pallas_src>

<mosaic_0001>
module attributes {stable_mosaic.version = 11 : i64} {
  func.func @mlp_kernel(%arg0: i32, %arg1: memref<16x1024xbf16, #tpu.memory_space<vmem>>, %arg2: memref<1024x512xbf16, #tpu.memory_space<vmem>>, %arg3: memref<1x512xf32, #tpu.memory_space<vmem>>, %arg4: memref<512x256xbf16, #tpu.memory_space<vmem>>, %arg5: memref<1x256xf32, #tpu.memory_space<vmem>>, %arg6: memref<256x128xbf16, #tpu.memory_space<vmem>>, %arg7: memref<1x128xf32, #tpu.memory_space<vmem>>, %arg8: memref<128x128xbf16, #tpu.memory_space<vmem>>, %arg9: memref<1x128xf32, #tpu.memory_space<vmem>>, %arg10: memref<16x128xbf16, #tpu.memory_space<vmem>>) attributes {dimension_semantics = [#tpu.dimension_semantics<parallel>], iteration_bounds = array<i64: 1>, scalar_prefetch = 0 : i64, scratch_operands = 0 : i64, tpu.core_type = #tpu.core_type<tc>, window_params = [{transform_indices = @transform_0, window_bounds = array<i64: 16, 1024>}, {pipeline_mode = #tpu.pipeline_mode<synchronous>, transform_indices = @transform_1, window_bounds = array<i64: 1024, 512>}, {pipeline_mode = #tpu.pipeline_mode<synchronous>, transform_indices = @transform_2, window_bounds = array<i64: 1, 512>}, {pipeline_mode = #tpu.pipeline_mode<synchronous>, transform_indices = @transform_3, window_bounds = array<i64: 512, 256>}, {pipeline_mode = #tpu.pipeline_mode<synchronous>, transform_indices = @transform_4, window_bounds = array<i64: 1, 256>}, {pipeline_mode = #tpu.pipeline_mode<synchronous>, transform_indices = @transform_5, window_bounds = array<i64: 256, 128>}, {pipeline_mode = #tpu.pipeline_mode<synchronous>, transform_indices = @transform_6, window_bounds = array<i64: 1, 128>}, {pipeline_mode = #tpu.pipeline_mode<synchronous>, transform_indices = @transform_7, window_bounds = array<i64: 128, 128>}, {pipeline_mode = #tpu.pipeline_mode<synchronous>, transform_indices = @transform_8, window_bounds = array<i64: 1, 128>}, {transform_indices = @transform_9, window_bounds = array<i64: 16, 128>}]} {
    %c0 = arith.constant 0 : index
    %c0_0 = arith.constant 0 : index
    %0 = vector.load %arg1[%c0, %c0_0] : memref<16x1024xbf16, #tpu.memory_space<vmem>>, vector<16x1024xbf16>
    %c0_1 = arith.constant 0 : index
    %c0_2 = arith.constant 0 : index
    %1 = vector.load %arg2[%c0_1, %c0_2] : memref<1024x512xbf16, #tpu.memory_space<vmem>>, vector<1024x512xbf16>
    %cst = arith.constant dense<0.000000e+00> : vector<16x512xf32>
    %2 = tpu.matmul %0, %1, %cst {dimension_numbers = #tpu.dot_dimension_numbers<[1], [0], [0], [1], [0, 0, 1, 1], [], []>} : vector<16x1024xbf16>, vector<1024x512xbf16>, vector<16x512xf32> -> vector<16x512xf32>
    %c0_3 = arith.constant 0 : index
    %c0_4 = arith.constant 0 : index
    %3 = vector.load %arg3[%c0_3, %c0_4] : memref<1x512xf32, #tpu.memory_space<vmem>>, vector<1x512xf32>
    %4 = vector.broadcast %3 : vector<1x512xf32> to vector<16x512xf32>
    %5 = arith.addf %2, %4 : vector<16x512xf32>
    %cst_5 = arith.constant 0.000000e+00 : f32
    %6 = vector.broadcast %cst_5 : f32 to vector<16x512xf32>
    %7 = arith.maximumf %5, %6 : vector<16x512xf32>
    %8 = arith.truncf %7 : vector<16x512xf32> to vector<16x512xbf16>
    %c0_6 = arith.constant 0 : index
    %c0_7 = arith.constant 0 : index
    %9 = vector.load %arg4[%c0_6, %c0_7] : memref<512x256xbf16, #tpu.memory_space<vmem>>, vector<512x256xbf16>
    %cst_8 = arith.constant dense<0.000000e+00> : vector<16x256xf32>
    %10 = tpu.matmul %8, %9, %cst_8 {dimension_numbers = #tpu.dot_dimension_numbers<[1], [0], [0], [1], [0, 0, 1, 1], [], []>} : vector<16x512xbf16>, vector<512x256xbf16>, vector<16x256xf32> -> vector<16x256xf32>
    %c0_9 = arith.constant 0 : index
    %c0_10 = arith.constant 0 : index
    %11 = vector.load %arg5[%c0_9, %c0_10] : memref<1x256xf32, #tpu.memory_space<vmem>>, vector<1x256xf32>
    %12 = vector.broadcast %11 : vector<1x256xf32> to vector<16x256xf32>
    %13 = arith.addf %10, %12 : vector<16x256xf32>
    %cst_11 = arith.constant 0.000000e+00 : f32
    %14 = vector.broadcast %cst_11 : f32 to vector<16x256xf32>
    %15 = arith.maximumf %13, %14 : vector<16x256xf32>
    %16 = arith.truncf %15 : vector<16x256xf32> to vector<16x256xbf16>
    %c0_12 = arith.constant 0 : index
    %c0_13 = arith.constant 0 : index
    %17 = vector.load %arg6[%c0_12, %c0_13] : memref<256x128xbf16, #tpu.memory_space<vmem>>, vector<256x128xbf16>
    %cst_14 = arith.constant dense<0.000000e+00> : vector<16x128xf32>
    %18 = tpu.matmul %16, %17, %cst_14 {dimension_numbers = #tpu.dot_dimension_numbers<[1], [0], [0], [1], [0, 0, 1, 1], [], []>} : vector<16x256xbf16>, vector<256x128xbf16>, vector<16x128xf32> -> vector<16x128xf32>
    %c0_15 = arith.constant 0 : index
    %c0_16 = arith.constant 0 : index
    %19 = vector.load %arg7[%c0_15, %c0_16] : memref<1x128xf32, #tpu.memory_space<vmem>>, vector<1x128xf32>
    %20 = vector.broadcast %19 : vector<1x128xf32> to vector<16x128xf32>
    %21 = arith.addf %18, %20 : vector<16x128xf32>
    %cst_17 = arith.constant 0.000000e+00 : f32
    %22 = vector.broadcast %cst_17 : f32 to vector<16x128xf32>
    %23 = arith.maximumf %21, %22 : vector<16x128xf32>
    %24 = arith.truncf %23 : vector<16x128xf32> to vector<16x128xbf16>
    %c0_18 = arith.constant 0 : index
    %c0_19 = arith.constant 0 : index
    %25 = vector.load %arg8[%c0_18, %c0_19] : memref<128x128xbf16, #tpu.memory_space<vmem>>, vector<128x128xbf16>
    %cst_20 = arith.constant dense<0.000000e+00> : vector<16x128xf32>
    %26 = tpu.matmul %24, %25, %cst_20 {dimension_numbers = #tpu.dot_dimension_numbers<[1], [0], [0], [1], [0, 0, 1, 1], [], []>} : vector<16x128xbf16>, vector<128x128xbf16>, vector<16x128xf32> -> vector<16x128xf32>
    %c0_21 = arith.constant 0 : index
    %c0_22 = arith.constant 0 : index
    %27 = vector.load %arg9[%c0_21, %c0_22] : memref<1x128xf32, #tpu.memory_space<vmem>>, vector<1x128xf32>
    %28 = vector.broadcast %27 : vector<1x128xf32> to vector<16x128xf32>
    %29 = arith.addf %26, %28 : vector<16x128xf32>
    %30 = arith.truncf %29 : vector<16x128xf32> to vector<16x128xbf16>
    %c0_23 = arith.constant 0 : index
    %c0_24 = arith.constant 0 : index
    %31 = vector.load %arg10[%c0_23, %c0_24] : memref<16x128xbf16, #tpu.memory_space<vmem>>, vector<16x128xbf16>
    tpu.vector_store %arg10[%c0_23, %c0_24], %30 {strides = array<i32>} : memref<16x128xbf16, #tpu.memory_space<vmem>>, vector<16x128xbf16>,
    return
  }
  func.func @transform_0(%arg0: i32) -> (i32, i32) {
    %c0_i32 = arith.constant 0 : i32
    %c0_i32_0 = arith.constant 0 : i32
    return %arg0, %c0_i32 : i32, i32
  }
  func.func @transform_1(%arg0: i32) -> (i32, i32) {
    %c0_i32 = arith.constant 0 : i32
    %c0_i32_0 = arith.constant 0 : i32
    %c0_i32_1 = arith.constant 0 : i32
    return %c0_i32, %c0_i32_0 : i32, i32
  }
  func.func @transform_2(%arg0: i32) -> (i32, i32) {
    %c0_i32 = arith.constant 0 : i32
    %c0_i32_0 = arith.constant 0 : i32
    %c0_i32_1 = arith.constant 0 : i32
    return %c0_i32, %c0_i32_0 : i32, i32
  }
  func.func @transform_3(%arg0: i32) -> (i32, i32) {
    %c0_i32 = arith.constant 0 : i32
    %c0_i32_0 = arith.constant 0 : i32
    %c0_i32_1 = arith.constant 0 : i32
    return %c0_i32, %c0_i32_0 : i32, i32
  }
  func.func @transform_4(%arg0: i32) -> (i32, i32) {
    %c0_i32 = arith.constant 0 : i32
    %c0_i32_0 = arith.constant 0 : i32
    %c0_i32_1 = arith.constant 0 : i32
    return %c0_i32, %c0_i32_0 : i32, i32
  }
  func.func @transform_5(%arg0: i32) -> (i32, i32) {
    %c0_i32 = arith.constant 0 : i32
    %c0_i32_0 = arith.constant 0 : i32
    %c0_i32_1 = arith.constant 0 : i32
    return %c0_i32, %c0_i32_0 : i32, i32
  }
  func.func @transform_6(%arg0: i32) -> (i32, i32) {
    %c0_i32 = arith.constant 0 : i32
    %c0_i32_0 = arith.constant 0 : i32
    %c0_i32_1 = arith.constant 0 : i32
    return %c0_i32, %c0_i32_0 : i32, i32
  }
  func.func @transform_7(%arg0: i32) -> (i32, i32) {
    %c0_i32 = arith.constant 0 : i32
    %c0_i32_0 = arith.constant 0 : i32
    %c0_i32_1 = arith.constant 0 : i32
    return %c0_i32, %c0_i32_0 : i32, i32
  }
  func.func @transform_8(%arg0: i32) -> (i32, i32) {
    %c0_i32 = arith.constant 0 : i32
    %c0_i32_0 = arith.constant 0 : i32
    %c0_i32_1 = arith.constant 0 : i32
    return %c0_i32, %c0_i32_0 : i32, i32
  }
  func.func @transform_9(%arg0: i32) -> (i32, i32) {
    %c0_i32 = arith.constant 0 : i32
    %c0_i32_0 = arith.constant 0 : i32
    return %arg0, %c0_i32 : i32, i32
  }
}

</mosaic_0001>

<bundles_post_ra>
// kernel: mlp_forward.1
= control target key start
LH: loop header
LB: loop body
LE: loop exit
PB: predicated region body
PF: predicated region fallthrough
CT: control target
= control target key end

     0   :  { %14 = vsyncpa [#allocation3], 0  ;;  %s4031_s0 = inlined_call_operand.vmem [shape: bf16[16,1024], index: 0, kind: input, shape index: {}]   ;;  %s4032_s1 = inlined_call_operand.hbm [shape: bf16[1024,512], index: 1, kind: input, shape index: {}]   ;;  %s4033_s2 = inlined_call_operand.vmem [shape: f32[1,512], index: 2, kind: input, shape index: {}]   ;;  %s4034_s3 = inlined_call_operand.hbm [shape: bf16[512,256], index: 3, kind: input, shape index: {}]   ;;  %s4035_s4 = inlined_call_operand.vmem [shape: f32[1,256], index: 4, kind: input, shape index: {}]   ;;  %s4036_s5 = inlined_call_operand.vmem [shape: bf16[256,128], index: 5, kind: input, shape index: {}]   ;;  %s4037_s6 = inlined_call_operand.vmem [shape: f32[1,128], index: 6, kind: input, shape index: {}]   ;;  %s4038_s7 = inlined_call_operand.vmem [shape: bf16[128,128], index: 7, kind: input, shape index: {}]   ;;  %s4039_s8 = inlined_call_operand.vmem [shape: f32[1,128], index: 8, kind: input, shape index: {}]   ;;  %s4040_s9 = inlined_call_operand.vmem [shape: bf16[16,128], index: 9, kind: output, shape index: {}]  }
   0x1   :  { %15 = vsyncpa [#allocation5], 0  ;;  %s3788_s30 = smov [#allocation2]  }
   0x2   :  { %s23_s10 = sshll.u32 %s3788_s30, 4  ;;  %s24_s10 = int_to_ptr.vmem [resolvable:$true] %s23_s10 }
   0x3   :  { %s3752_s11 = scalar_lea.vmem %s24_s10, 32768  ;;  %p3757_p1 = scmp.lt.s32.totalorder %s24_s10, %s24_s10 }
   0x4   :  { %p3753_p0 = scmp.ne.s32.totalorder %s24_s10, %s3752_s11  ;;  %p3758_p2 = scmp.lt.s32.totalorder %s3752_s11, %s3752_s11 }
   0x6   :  { %p3759_p3 = por %p3758_p2, %p3757_p1 }
   0x8   :  { %p3760_p4 = pnand %p3759_p3, %p3753_p0 }
   0xa   :  { %3763 = shalt.err (!%p3760_p4)
}
   0xb   :  { %s3789_s12 = smov 256   ;;  %s3790_s13 = smov 16  }
   0xc   :  { %29 = dma.hbm_to_vmem [thread:$0]  %s4032_s1, 32768, %s24_s10, [#allocation3], %s3789_s12, %s3789_s12, %s3790_s13  }
   0xd   :  { %s3791_s16 = smov [#allocation4]  }
   0xe   :  { %s37_s17 = sshll.u32 %s3791_s16, 4  ;;  %s38_s17 = int_to_ptr.vmem [resolvable:$true] %s37_s17 }
   0xf   :  { %s3772_s18 = scalar_lea.vmem %s38_s17, 8192  ;;  %p3777_p6 = scmp.lt.s32.totalorder %s38_s17, %s38_s17 }
  0x10   :  { %p3773_p5 = scmp.ne.s32.totalorder %s38_s17, %s3772_s18  ;;  %p3778_p7 = scmp.lt.s32.totalorder %s3772_s18, %s3772_s18 }
  0x12   :  { %p3779_p8 = por %p3778_p7, %p3777_p6 }
  0x14   :  { %p3780_p9 = pnand %p3779_p8, %p3773_p5 }
  0x16   :  { %3783 = shalt.err (!%p3780_p9)
}
  0x17   :  { %s3792_s19 = smov 128   ;;  %s3793_s20 = smov 8  }
  0x18   :  { %43 = dma.hbm_to_vmem [thread:$0]  %s4034_s3, 8192, %s38_s17, [#allocation5], %s3792_s19, %s3792_s19, %s3793_s20  }
  0x19   :  { %3784 = dma.done.wait [#allocation3], 32768  }
  0x1a   :  { %3785 = vsyncadd [#allocation3], 4294934528 }
  0x1b   :  { %3786 = dma.done.wait [#allocation5], 8192  }
  0x1c   :  { %3787 = vsyncadd [#allocation5], 4294959104  ;;  %v3240_v0 = vld [vmem:[#allocation2 + $0xe4] ss:$16 sps:$4 sm:$0xff]   ;;  %v3244_v2 = vld [vmem:[#allocation2 + $0xe0] ss:$16 sps:$4 sm:$0xff]  }
  0x1d   :  { %v3242_v1 = vld [vmem:[#allocation2 + $0x2e4] ss:$16 sps:$4 sm:$0xff]   ;;  %1667 = vmatprep.subr.bf16.mxu0 %v3240_v0  ;;  %v3245_v3 = vld [vmem:[#allocation2 + $0x2e0] ss:$16 sps:$4 sm:$0xff]   ;;  %v62_v50 = vld [vmem:[%s4031_s0 + $0x8] sm:$0xff]  ;;  %vm3795_vm0 = vmmov 0  }
  0x1e   :  { %1710 = vmatprep.subr.bf16.mxu1 %v3242_v1  ;;  %v3246_v4 = vld [vmem:[#allocation2 + $0xc4] ss:$16 sps:$4 sm:$0xff]   ;;  %1668 = vmatpush1.bf16.msra.mxu0 %v3244_v2  ;;  %v3250_v6 = vld [vmem:[#allocation2 + $0xc0] ss:$16 sps:$4 sm:$0xff]   ;;  %v66_v51 = vld [vmem:[%s4031_s0 + $0x28] sm:$0xff] }
  0x1f   :  { %1711 = vmatpush1.bf16.msra.mxu1 %v3245_v3  ;;  %v3248_v5 = vld [vmem:[#allocation2 + $0x2c4] ss:$16 sps:$4 sm:$0xff]   ;;  %1669 = vmatprep.subr.bf16.mxu0 %v3246_v4  ;;  %v3251_v7 = vld [vmem:[#allocation2 + $0x2c0] ss:$16 sps:$4 sm:$0xff]   ;;  %v3866_v55 = vcombine.high %v62_v50, %v66_v51 }
  0x20   :  { %1712 = vmatprep.subr.bf16.mxu1 %v3248_v5  ;;  %v3252_v8 = vld [vmem:[#allocation2 + $0xa4] ss:$16 sps:$4 sm:$0xff]   ;;  %v3256_v10 = vld [vmem:[#allocation2 + $0xa0] ss:$16 sps:$4 sm:$0xff]  }
  0x21   :  { %v3254_v9 = vld [vmem:[#allocation2 + $0x2a4] ss:$16 sps:$4 sm:$0xff]   ;;  %v3257_v11 = vld [vmem:[#allocation2 + $0x2a0] ss:$16 sps:$4 sm:$0xff]   ;;  %1742 = vmatprep.mubr.bf16.mxu1 %v3866_v55 }
  0x22   :  { %1670 = vmatpush1.bf16.msra.mxu0 %v3250_v6  ;;  %v3258_v12 = vld [vmem:[#allocation2 + $0x84] ss:$16 sps:$4 sm:$0xff]   ;;  %v3262_v14 = vld [vmem:[#allocation2 + $0x80] ss:$16 sps:$4 sm:$0xff]  }
  0x23   :  { %1713 = vmatpush1.bf16.msra.mxu1 %v3251_v7  ;;  %1671 = vmatprep.subr.bf16.mxu0 %v3252_v8  ;;  %v3260_v13 = vld [vmem:[#allocation2 + $0x284] ss:$16 sps:$4 sm:$0xff]   ;;  %v3263_v15 = vld [vmem:[#allocation2 + $0x280] ss:$16 sps:$4 sm:$0xff]  }
  0x24   :  { %1714 = vmatprep.subr.bf16.mxu1 %v3254_v9  ;;  %v3264_v16 = vld [vmem:[#allocation2 + $0x64] ss:$16 sps:$4 sm:$0xff]   ;;  %v3268_v18 = vld [vmem:[#allocation2 + $0x60] ss:$16 sps:$4 sm:$0xff]   ;;  %v3872_v9 = vcombine.low %v62_v50, %v66_v51 }
  0x25   :  { %v3266_v17 = vld [vmem:[#allocation2 + $0x264] ss:$16 sps:$4 sm:$0xff]   ;;  %v3269_v19 = vld [vmem:[#allocation2 + $0x260] ss:$16 sps:$4 sm:$0xff]  }
  0x26   :  { %1672 = vmatpush1.bf16.msra.mxu0 %v3256_v10  ;;  %v3270_v20 = vld [vmem:[#allocation2 + $0x44] ss:$16 sps:$4 sm:$0xff]   ;;  %v3274_v22 = vld [vmem:[#allocation2 + $0x40] ss:$16 sps:$4 sm:$0xff]  }
  0x27   :  { %1715 = vmatpush1.bf16.msra.mxu1 %v3257_v11  ;;  %1673 = vmatprep.subr.bf16.mxu0 %v3258_v12  ;;  %v3272_v21 = vld [vmem:[#allocation2 + $0x244] ss:$16 sps:$4 sm:$0xff]   ;;  %v3275_v23 = vld [vmem:[#allocation2 + $0x240] ss:$16 sps:$4 sm:$0xff]  }
  0x28   :  { %1716 = vmatprep.subr.bf16.mxu1 %v3260_v13  ;;  %v3276_v24 = vld [vmem:[#allocation2 + $0x24] ss:$16 sps:$4 sm:$0xff]   ;;  %v3280_v26 = vld [vmem:[#allocation2 + $0x20] ss:$16 sps:$4 sm:$0xff]  }
  0x29   :  { %v3278_v25 = vld [vmem:[#allocation2 + $0x224] ss:$16 sps:$4 sm:$0xff]   ;;  %v3281_v27 = vld [vmem:[#allocation2 + $0x220] ss:$16 sps:$4 sm:$0xff]  }
  0x2a   :  { %1674 = vmatpush1.bf16.msra.mxu0 %v3262_v14  ;;  %v3282_v28 = vld [vmem:[#allocation2 + $0x4] ss:$16 sps:$4 sm:$0xff]   ;;  %v3286_v30 = vld [vmem:[#allocation2] ss:$16 sps:$4 sm:$0xff]  }
  0x2b   :  { %1717 = vmatpush1.bf16.msra.mxu1 %v3263_v15  ;;  %1675 = vmatprep.subr.bf16.mxu0 %v3264_v16  ;;  %v3284_v29 = vld [vmem:[#allocation2 + $0x204] ss:$16 sps:$4 sm:$0xff]   ;;  %v3287_v31 = vld [vmem:[#allocation2 + $0x200] ss:$16 sps:$4 sm:$0xff]  }
  0x2c   :  { %1718 = vmatprep.subr.bf16.mxu1 %v3266_v17  ;;  %v3288_v32 = vld [vmem:[#allocation2 + $0x1e4] ss:$16 sps:$4 sm:$0xff]   ;;  %v3292_v34 = vld [vmem:[#allocation2 + $0x1e0] ss:$16 sps:$4 sm:$0xff]  }
  0x2d   :  { %v3290_v33 = vld [vmem:[#allocation2 + $0x3e4] ss:$16 sps:$4 sm:$0xff]   ;;  %v3293_v35 = vld [vmem:[#allocation2 + $0x3e0] ss:$16 sps:$4 sm:$0xff]  }
  0x2e   :  { %1676 = vmatpush1.bf16.msra.mxu0 %v3268_v18  ;;  %v3294_v36 = vld [vmem:[#allocation2 + $0x1c4] ss:$16 sps:$4 sm:$0xff]   ;;  %v3298_v38 = vld [vmem:[#allocation2 + $0x1c0] ss:$16 sps:$4 sm:$0xff]  }
  0x2f   :  { %1719 = vmatpush1.bf16.msra.mxu1 %v3269_v19  ;;  %1677 = vmatprep.subr.bf16.mxu0 %v3270_v20  ;;  %v3296_v37 = vld [vmem:[#allocation2 + $0x3c4] ss:$16 sps:$4 sm:$0xff]   ;;  %v3299_v39 = vld [vmem:[#allocation2 + $0x3c0] ss:$16 sps:$4 sm:$0xff]  }
  0x30   :  { %1720 = vmatprep.subr.bf16.mxu1 %v3272_v21  ;;  %v3300_v40 = vld [vmem:[#allocation2 + $0x1a4] ss:$16 sps:$4 sm:$0xff]   ;;  %v3304_v42 = vld [vmem:[#allocation2 + $0x1a0] ss:$16 sps:$4 sm:$0xff]  }
  0x31   :  { %v3302_v41 = vld [vmem:[#allocation2 + $0x3a4] ss:$16 sps:$4 sm:$0xff]   ;;  %v3305_v43 = vld [vmem:[#allocation2 + $0x3a0] ss:$16 sps:$4 sm:$0xff]  }
  0x32   :  { %1678 = vmatpush1.bf16.msra.mxu0 %v3274_v22  ;;  %v3306_v44 = vld [vmem:[#allocation2 + $0x184] ss:$16 sps:$4 sm:$0xff]   ;;  %v3310_v46 = vld [vmem:[#allocation2 + $0x180] ss:$16 sps:$4 sm:$0xff]  }
  0x33   :  { %1721 = vmatpush1.bf16.msra.mxu1 %v3275_v23  ;;  %1679 = vmatprep.subr.bf16.mxu0 %v3276_v24  ;;  %v3308_v45 = vld [vmem:[#allocation2 + $0x384] ss:$16 sps:$4 sm:$0xff]   ;;  %v3311_v47 = vld [vmem:[#allocation2 + $0x380] ss:$16 sps:$4 sm:$0xff]  }
  0x34   :  { %1722 = vmatprep.subr.bf16.mxu1 %v3278_v25  ;;  %v61_v48 = vld [vmem:[%s4031_s0] sm:$0xff] }
  0x35   :  { %v65_v49 = vld [vmem:[%s4031_s0 + $0x20] sm:$0xff] }
  0x36   :  { %1680 = vmatpush1.bf16.msra.mxu0 %v3280_v26  ;;  %v3312_v52 = vld [vmem:[#allocation2 + $0x164] ss:$16 sps:$4 sm:$0xff]   ;;  %v3864_v53 = vcombine.high %v61_v48, %v65_v49  ;;  %v3316_v56 = vld [vmem:[#allocation2 + $0x160] ss:$16 sps:$4 sm:$0xff]   ;;  %v3870_v8 = vcombine.low %v61_v48, %v65_v49 }
  0x37   :  { %1723 = vmatpush1.bf16.msra.mxu1 %v3281_v27  ;;  %1681 = vmatprep.subr.bf16.mxu0 %v3282_v28  ;;  %v3314_v54 = vld [vmem:[#allocation2 + $0x364] ss:$16 sps:$4 sm:$0xff]   ;;  %v3317_v57 = vld [vmem:[#allocation2 + $0x360] ss:$16 sps:$4 sm:$0xff]  }
  0x38   :  { %1724 = vmatprep.subr.bf16.mxu1 %v3284_v29  ;;  %1699 = vmatprep.mubr.bf16.mxu0 %v3864_v53  ;;  %v3318_v58 = vld [vmem:[#allocation2 + $0x144] ss:$16 sps:$4 sm:$0xff]   ;;  %v3322_v60 = vld [vmem:[#allocation2 + $0x140] ss:$16 sps:$4 sm:$0xff]  }
  0x39   :  { %v3320_v59 = vld [vmem:[#allocation2 + $0x344] ss:$16 sps:$4 sm:$0xff]   ;;  %v3323_v61 = vld [vmem:[#allocation2 + $0x340] ss:$16 sps:$4 sm:$0xff]  }
  0x3a   :  { %1682 = vmatpush1.bf16.msra.mxu0 %v3286_v30  ;;  %v3324_v62 = vld [vmem:[#allocation2 + $0x124] ss:$16 sps:$4 sm:$0xff]   ;;  %v3328_v0 = vld [vmem:[#allocation2 + $0x120] ss:$16 sps:$4 sm:$0xff]  }
  0x3b   :  { %1725 = vmatpush1.bf16.msra.mxu1 %v3287_v31  ;;  %1683 = vmatprep.subr.bf16.mxu0 %v3288_v32  ;;  %v3326_v63 = vld [vmem:[#allocation2 + $0x324] ss:$16 sps:$4 sm:$0xff]   ;;  %v3329_v1 = vld [vmem:[#allocation2 + $0x320] ss:$16 sps:$4 sm:$0xff]  }
  0x3c   :  { %1726 = vmatprep.subr.bf16.mxu1 %v3290_v33  ;;  %v3330_v2 = vld [vmem:[#allocation2 + $0x104] ss:$16 sps:$4 sm:$0xff]   ;;  %v3334_v4 = vld [vmem:[#allocation2 + $0x100] ss:$16 sps:$4 sm:$0xff]  }
  0x3d   :  { %v3332_v3 = vld [vmem:[#allocation2 + $0x304] ss:$16 sps:$4 sm:$0xff]   ;;  %v3335_v5 = vld [vmem:[#allocation2 + $0x300] ss:$16 sps:$4 sm:$0xff]  }
  0x3e   :  { %1684 = vmatpush2.bf16.msra.mxu0 %v3292_v34  ;;  %v3338_v6 = vld [vmem:[#allocation2 + $0x4e4] ss:$16 sps:$4 sm:$0xff]   ;;  %v3336_v10 = vld [vmem:[#allocation2 + $0x4e0] ss:$16 sps:$4 sm:$0xff]  }
  0x3f   :  { %1727 = vmatpush2.bf16.msra.mxu1 %v3293_v35  ;;  %1685 = vmatprep.subr.bf16.mxu0 %v3294_v36  ;;  %v3341_v7 = vld [vmem:[#allocation2 + $0x6e4] ss:$16 sps:$4 sm:$0xff]   ;;  %v3339_v11 = vld [vmem:[#allocation2 + $0x6e0] ss:$16 sps:$4 sm:$0xff]  }
  0x40   :  { %1728 = vmatprep.subr.bf16.mxu1 %v3296_v37  ;;  %v3344_v12 = vld [vmem:[#allocation2 + $0x4c4] ss:$16 sps:$4 sm:$0xff]   ;;  %v3342_v14 = vld [vmem:[#allocation2 + $0x4c0] ss:$16 sps:$4 sm:$0xff]  }
  0x41   :  { %v3347_v13 = vld [vmem:[#allocation2 + $0x6c4] ss:$16 sps:$4 sm:$0xff]   ;;  %v3345_v15 = vld [vmem:[#allocation2 + $0x6c0] ss:$16 sps:$4 sm:$0xff]  }
  0x42   :  { %1686 = vmatpush2.bf16.msra.mxu0 %v3298_v38  ;;  %v3350_v16 = vld [vmem:[#allocation2 + $0x4a4] ss:$16 sps:$4 sm:$0xff]   ;;  %v3348_v18 = vld [vmem:[#allocation2 + $0x4a0] ss:$16 sps:$4 sm:$0xff]   ;;  %v3889_v38 = vld [vmem:[%s4031_s0 + $0x18] sm:$0xff] }
  0x43   :  { %1729 = vmatpush2.bf16.msra.mxu1 %v3299_v39  ;;  %1687 = vmatprep.subr.bf16.mxu0 %v3300_v40  ;;  %v3353_v17 = vld [vmem:[#allocation2 + $0x6a4] ss:$16 sps:$4 sm:$0xff]   ;;  %v3351_v19 = vld [vmem:[#allocation2 + $0x6a0] ss:$16 sps:$4 sm:$0xff]   ;;  %v3894_v39 = vld [vmem:[%s4031_s0 + $0x38] sm:$0xff] }
  0x44   :  { %1730 = vmatprep.subr.bf16.mxu1 %v3302_v41  ;;  %v3356_v20 = vld [vmem:[#allocation2 + $0x484] ss:$16 sps:$4 sm:$0xff]   ;;  %v3354_v22 = vld [vmem:[#allocation2 + $0x480] ss:$16 sps:$4 sm:$0xff]  }
  0x45   :  { %v3359_v21 = vld [vmem:[#allocation2 + $0x684] ss:$16 sps:$4 sm:$0xff]   ;;  %v3357_v23 = vld [vmem:[#allocation2 + $0x680] ss:$16 sps:$4 sm:$0xff]  }
  0x46   :  { %1688 = vmatpush2.bf16.msra.mxu0 %v3304_v42  ;;  %v3362_v24 = vld [vmem:[#allocation2 + $0x464] ss:$16 sps:$4 sm:$0xff]   ;;  %v3360_v26 = vld [vmem:[#allocation2 + $0x460] ss:$16 sps:$4 sm:$0xff]  }
  0x47   :  { %1731 = vmatpush2.bf16.msra.mxu1 %v3305_v43  ;;  %1689 = vmatprep.subr.bf16.mxu0 %v3306_v44  ;;  %v3365_v25 = vld [vmem:[#allocation2 + $0x664] ss:$16 sps:$4 sm:$0xff]   ;;  %v3363_v27 = vld [vmem:[#allocation2 + $0x660] ss:$16 sps:$4 sm:$0xff]   ;;  %v3902_v43 = vcombine.high %v3889_v38, %v3894_v39 }
  0x48   :  { %1732 = vmatprep.subr.bf16.mxu1 %v3308_v45  ;;  %v3368_v28 = vld [vmem:[#allocation2 + $0x444] ss:$16 sps:$4 sm:$0xff]   ;;  %v3366_v30 = vld [vmem:[#allocation2 + $0x440] ss:$16 sps:$4 sm:$0xff]  }
  0x49   :  { %v3371_v29 = vld [vmem:[#allocation2 + $0x644] ss:$16 sps:$4 sm:$0xff]   ;;  %v3369_v31 = vld [vmem:[#allocation2 + $0x640] ss:$16 sps:$4 sm:$0xff]  }
  0x4a   :  { %1690 = vmatpush2.bf16.msra.mxu0 %v3310_v46  ;;  %v3374_v32 = vld [vmem:[#allocation2 + $0x424] ss:$16 sps:$4 sm:$0xff]   ;;  %v3372_v34 = vld [vmem:[#allocation2 + $0x420] ss:$16 sps:$4 sm:$0xff]  }
  0x4b   :  { %1733 = vmatpush2.bf16.msra.mxu1 %v3311_v47  ;;  %1691 = vmatprep.subr.bf16.mxu0 %v3312_v52  ;;  %v3377_v33 = vld [vmem:[#allocation2 + $0x624] ss:$16 sps:$4 sm:$0xff]   ;;  %v3375_v35 = vld [vmem:[#allocation2 + $0x620] ss:$16 sps:$4 sm:$0xff]  }
  0x4c   :  { %1734 = vmatprep.subr.bf16.mxu1 %v3314_v54  ;;  %v3879_v36 = vld [vmem:[%s4031_s0 + $0x10] sm:$0xff] }
  0x4d   :  { %v3884_v37 = vld [vmem:[%s4031_s0 + $0x30] sm:$0xff] }
  0x4e   :  { %1692 = vmatpush2.bf16.msra.mxu0 %v3316_v56  ;;  %v3380_v40 = vld [vmem:[#allocation2 + $0x404] ss:$16 sps:$4 sm:$0xff]   ;;  %v3898_v41 = vcombine.high %v3879_v36, %v3884_v37  ;;  %v3378_v44 = vld [vmem:[#allocation2 + $0x400] ss:$16 sps:$4 sm:$0xff]  }
  0x4f   :  { %1735 = vmatpush2.bf16.msra.mxu1 %v3317_v57  ;;  %1693 = vmatprep.subr.bf16.mxu0 %v3318_v58  ;;  %v3383_v42 = vld [vmem:[#allocation2 + $0x604] ss:$16 sps:$4 sm:$0xff]   ;;  %v3381_v45 = vld [vmem:[#allocation2 + $0x600] ss:$16 sps:$4 sm:$0xff]  }
  0x50   :  { %1736 = vmatprep.subr.bf16.mxu1 %v3320_v59  ;;  %v3386_v46 = vld [vmem:[#allocation2 + $0x5e4] ss:$16 sps:$4 sm:$0xff]   ;;  %v3384_v48 = vld [vmem:[#allocation2 + $0x5e0] ss:$16 sps:$4 sm:$0xff]  }
  0x51   :  { %v3389_v47 = vld [vmem:[#allocation2 + $0x7e4] ss:$16 sps:$4 sm:$0xff]   ;;  %v3387_v49 = vld [vmem:[#allocation2 + $0x7e0] ss:$16 sps:$4 sm:$0xff]  }
  0x52   :  { %1694 = vmatpush2.bf16.msra.mxu0 %v3322_v60  ;;  %v3392_v50 = vld [vmem:[#allocation2 + $0x5c4] ss:$16 sps:$4 sm:$0xff]   ;;  %v3390_v52 = vld [vmem:[#allocation2 + $0x5c0] ss:$16 sps:$4 sm:$0xff]  }
  0x53   :  { %1737 = vmatpush2.bf16.msra.mxu1 %v3323_v61  ;;  %1695 = vmatprep.subr.bf16.mxu0 %v3324_v62  ;;  %v3395_v51 = vld [vmem:[#allocation2 + $0x7c4] ss:$16 sps:$4 sm:$0xff]   ;;  %v3393_v54 = vld [vmem:[#allocation2 + $0x7c0] ss:$16 sps:$4 sm:$0xff]  }
  0x54   :  { %1738 = vmatprep.subr.bf16.mxu1 %v3326_v63  ;;  %v3398_v56 = vld [vmem:[#allocation2 + $0x5a4] ss:$16 sps:$4 sm:$0xff]   ;;  %v3396_v58 = vld [vmem:[#allocation2 + $0x5a0] ss:$16 sps:$4 sm:$0xff]  }
  0x55   :  { %v3401_v57 = vld [vmem:[#allocation2 + $0x7a4] ss:$16 sps:$4 sm:$0xff]   ;;  %v3399_v59 = vld [vmem:[#allocation2 + $0x7a0] ss:$16 sps:$4 sm:$0xff]  }
  0x56   :  { %1696 = vmatpush2.bf16.msra.mxu0 %v3328_v0  ;;  %v3404_v60 = vld [vmem:[#allocation2 + $0x584] ss:$16 sps:$4 sm:$0xff]   ;;  %v3402_v62 = vld [vmem:[#allocation2 + $0x580] ss:$16 sps:$4 sm:$0xff]  }
  0x57   :  { %1739 = vmatpush2.bf16.msra.mxu1 %v3329_v1  ;;  %1697 = vmatprep.subr.bf16.mxu0 %v3330_v2  ;;  %v3407_v61 = vld [vmem:[#allocation2 + $0x784] ss:$16 sps:$4 sm:$0xff]   ;;  %v3405_v63 = vld [vmem:[#allocation2 + $0x780] ss:$16 sps:$4 sm:$0xff]  }
  0x58   :  { %1740 = vmatprep.subr.bf16.mxu1 %v3332_v3  ;;  %v3410_v0 = vld [vmem:[#allocation2 + $0x564] ss:$16 sps:$4 sm:$0xff]   ;;  %v3408_v2 = vld [vmem:[#allocation2 + $0x560] ss:$16 sps:$4 sm:$0xff]  }
  0x59   :  { %v3413_v1 = vld [vmem:[#allocation2 + $0x764] ss:$16 sps:$4 sm:$0xff]   ;;  %v3411_v3 = vld [vmem:[#allocation2 + $0x760] ss:$16 sps:$4 sm:$0xff]  }
  0x5a   :  { %1698 = vmatpush2.bf16.msra.mxu0 %v3334_v4  ;;  %v3416_v4 = vld [vmem:[#allocation2 + $0x544] ss:$16 sps:$4 sm:$0xff]  }
  0x5b   :  { %1741 = vmatpush2.bf16.msra.mxu1 %v3335_v5  ;;  %1753 = vmatprep.subr.bf16.mxu0 %v3338_v6  ;;  %v3419_v5 = vld [vmem:[#allocation2 + $0x744] ss:$16 sps:$4 sm:$0xff]   ;;  %v3414_v6 = vld [vmem:[#allocation2 + $0x540] ss:$16 sps:$4 sm:$0xff]  }
  0x5c   :  { %1796 = vmatprep.subr.bf16.mxu1 %v3341_v7  ;;  %v3417_v7 = vld [vmem:[#allocation2 + $0x740] ss:$16 sps:$4 sm:$0xff]  }
  0x5d   :  { %1700 = vmatmul.mubr.bf16.vlgmr.msra.gmra.mxu0 %v3870_v8 }
  0x5e   :  { %1743 = vmatmul.mubr.bf16.vlgmr.msra.gmra.mxu1 %v3872_v9  ;;  %1754 = vmatpush1.bf16.msra.mxu0 %v3336_v10  ;;  %v3422_v10 = vld [vmem:[#allocation2 + $0x524] ss:$16 sps:$4 sm:$0xff]  }
  0x5f   :  { %1797 = vmatpush1.bf16.msra.mxu1 %v3339_v11  ;;  %1755 = vmatprep.subr.bf16.mxu0 %v3344_v12  ;;  %v3425_v11 = vld [vmem:[#allocation2 + $0x724] ss:$16 sps:$4 sm:$0xff]   ;;  %v3420_v12 = vld [vmem:[#allocation2 + $0x520] ss:$16 sps:$4 sm:$0xff]  }
  0x60   :  { %1798 = vmatprep.subr.bf16.mxu1 %v3347_v13  ;;  %1785 = vmatprep.mubr.bf16.mxu0 %v3898_v41  ;;  %v3423_v13 = vld [vmem:[#allocation2 + $0x720] ss:$16 sps:$4 sm:$0xff]  }
  0x61   :  { %1828 = vmatprep.mubr.bf16.mxu1 %v3902_v43 }
  0x62   :  { %1756 = vmatpush1.bf16.msra.mxu0 %v3342_v14  ;;  %v3428_v14 = vld [vmem:[#allocation2 + $0x504] ss:$16 sps:$4 sm:$0xff]  }
  0x63   :  { %1799 = vmatpush1.bf16.msra.mxu1 %v3345_v15  ;;  %1757 = vmatprep.subr.bf16.mxu0 %v3350_v16  ;;  %v3431_v15 = vld [vmem:[#allocation2 + $0x704] ss:$16 sps:$4 sm:$0xff]   ;;  %v3426_v16 = vld [vmem:[#allocation2 + $0x500] ss:$16 sps:$4 sm:$0xff]  }
  0x64   :  { %1800 = vmatprep.subr.bf16.mxu1 %v3353_v17  ;;  %v3429_v17 = vld [vmem:[#allocation2 + $0x700] ss:$16 sps:$4 sm:$0xff]  }
  0x66   :  { %1758 = vmatpush1.bf16.msra.mxu0 %v3348_v18  ;;  %v3434_v18 = vld [vmem:[#allocation2 + $0xec] ss:$16 sps:$4 sm:$0xff]  }
  0x67   :  { %1801 = vmatpush1.bf16.msra.mxu1 %v3351_v19  ;;  %1759 = vmatprep.subr.bf16.mxu0 %v3356_v20  ;;  %v3437_v19 = vld [vmem:[#allocation2 + $0x2ec] ss:$16 sps:$4 sm:$0xff]   ;;  %v3908_v20 = vcombine.low %v3879_v36, %v3884_v37 }
  0x68   :  { %1802 = vmatprep.subr.bf16.mxu1 %v3359_v21  ;;  %v3912_v21 = vcombine.low %v3889_v38, %v3894_v39  ;;  %v3458_v36 = vld [vmem:[#allocation2 + $0x6c] ss:$16 sps:$4 sm:$0xff]   ;;  %v3456_v38 = vld [vmem:[#allocation2 + $0x68] ss:$16 sps:$4 sm:$0xff]  }
  0x69   :  { %v3461_v37 = vld [vmem:[#allocation2 + $0x26c] ss:$16 sps:$4 sm:$0xff]  }
  0x6a   :  { %1760 = vmatpush1.bf16.msra.mxu0 %v3354_v22  ;;  %v3432_v22 = vld [vmem:[#allocation2 + $0xe8] ss:$16 sps:$4 sm:$0xff]   ;;  %v3467_v39 = vld [vmem:[#allocation2 + $0x24c] ss:$16 sps:$4 sm:$0xff]  }
  0x6b   :  { %1803 = vmatpush1.bf16.msra.mxu1 %v3357_v23  ;;  %1761 = vmatprep.subr.bf16.mxu0 %v3362_v24  ;;  %v3435_v23 = vld [vmem:[#allocation2 + $0x2e8] ss:$16 sps:$4 sm:$0xff]   ;;  %v3440_v24 = vld [vmem:[#allocation2 + $0xcc] ss:$16 sps:$4 sm:$0xff]  }
  0x6c   :  { %1804 = vmatprep.subr.bf16.mxu1 %v3365_v25  ;;  %v3443_v25 = vld [vmem:[#allocation2 + $0x2cc] ss:$16 sps:$4 sm:$0xff]  }
  0x6e   :  { %1762 = vmatpush1.bf16.msra.mxu0 %v3360_v26  ;;  %v3438_v26 = vld [vmem:[#allocation2 + $0xc8] ss:$16 sps:$4 sm:$0xff]  }
  0x6f   :  { %1805 = vmatpush1.bf16.msra.mxu1 %v3363_v27  ;;  %1763 = vmatprep.subr.bf16.mxu0 %v3368_v28  ;;  %v3441_v27 = vld [vmem:[#allocation2 + $0x2c8] ss:$16 sps:$4 sm:$0xff]   ;;  %v3446_v28 = vld [vmem:[#allocation2 + $0xac] ss:$16 sps:$4 sm:$0xff]  }
  0x70   :  { %1806 = vmatprep.subr.bf16.mxu1 %v3371_v29  ;;  %v3449_v29 = vld [vmem:[#allocation2 + $0x2ac] ss:$16 sps:$4 sm:$0xff]  }
  0x72   :  { %1764 = vmatpush1.bf16.msra.mxu0 %v3366_v30  ;;  %v3444_v30 = vld [vmem:[#allocation2 + $0xa8] ss:$16 sps:$4 sm:$0xff]  }
  0x73   :  { %1807 = vmatpush1.bf16.msra.mxu1 %v3369_v31  ;;  %1765 = vmatprep.subr.bf16.mxu0 %v3374_v32  ;;  %v3447_v31 = vld [vmem:[#allocation2 + $0x2a8] ss:$16 sps:$4 sm:$0xff]   ;;  %v3452_v32 = vld [vmem:[#allocation2 + $0x8c] ss:$16 sps:$4 sm:$0xff]  }
  0x74   :  { %1808 = vmatprep.subr.bf16.mxu1 %v3377_v33  ;;  %v3455_v33 = vld [vmem:[#allocation2 + $0x28c] ss:$16 sps:$4 sm:$0xff]  }
  0x76   :  { %1766 = vmatpush1.bf16.msra.mxu0 %v3372_v34  ;;  %v3450_v34 = vld [vmem:[#allocation2 + $0x88] ss:$16 sps:$4 sm:$0xff]  }
  0x77   :  { %1809 = vmatpush1.bf16.msra.mxu1 %v3375_v35  ;;  %1767 = vmatprep.subr.bf16.mxu0 %v3380_v40  ;;  %v3453_v35 = vld [vmem:[#allocation2 + $0x288] ss:$16 sps:$4 sm:$0xff]  }
  0x78   :  { %1810 = vmatprep.subr.bf16.mxu1 %v3383_v42  ;;  %v3462_v40 = vld [vmem:[#allocation2 + $0x48] ss:$16 sps:$4 sm:$0xff]  }
  0x79   :  { %v3465_v42 = vld [vmem:[#allocation2 + $0x248] ss:$16 sps:$4 sm:$0xff]  }
  0x7a   :  { %1768 = vmatpush1.bf16.msra.mxu0 %v3378_v44  ;;  %v3470_v44 = vld [vmem:[#allocation2 + $0x2c] ss:$16 sps:$4 sm:$0xff]  }
  0x7b   :  { %1811 = vmatpush1.bf16.msra.mxu1 %v3381_v45  ;;  %1769 = vmatprep.subr.bf16.mxu0 %v3386_v46  ;;  %v3473_v45 = vld [vmem:[#allocation2 + $0x22c] ss:$16 sps:$4 sm:$0xff]   ;;  %v3468_v46 = vld [vmem:[#allocation2 + $0x28] ss:$16 sps:$4 sm:$0xff]  }
  0x7c   :  { %1812 = vmatprep.subr.bf16.mxu1 %v3389_v47  ;;  %v3471_v47 = vld [vmem:[#allocation2 + $0x228] ss:$16 sps:$4 sm:$0xff]  }
  0x7e   :  { %1770 = vmatpush2.bf16.msra.mxu0 %v3384_v48  ;;  %v3476_v48 = vld [vmem:[#allocation2 + $0xc] ss:$16 sps:$4 sm:$0xff]  }
  0x7f   :  { %1813 = vmatpush2.bf16.msra.mxu1 %v3387_v49  ;;  %1771 = vmatprep.subr.bf16.mxu0 %v3392_v50  ;;  %v3479_v49 = vld [vmem:[#allocation2 + $0x20c] ss:$16 sps:$4 sm:$0xff]   ;;  %v3474_v50 = vld [vmem:[#allocation2 + $0x8] ss:$16 sps:$4 sm:$0xff]  }
  0x80   :  { %1814 = vmatprep.subr.bf16.mxu1 %v3395_v51  ;;  %v3477_v51 = vld [vmem:[#allocation2 + $0x208] ss:$16 sps:$4 sm:$0xff]  }
  0x82   :  { %1772 = vmatpush2.bf16.msra.mxu0 %v3390_v52  ;;  %v3482_v52 = vld [vmem:[#allocation2 + $0x1ec] ss:$16 sps:$4 sm:$0xff]  }
  0x83   :  { %1815 = vmatpush2.bf16.msra.mxu1 %v3393_v54  ;;  %1773 = vmatprep.subr.bf16.mxu0 %v3398_v56  ;;  %v3485_v54 = vld [vmem:[#allocation2 + $0x3ec] ss:$16 sps:$4 sm:$0xff]   ;;  %v3480_v56 = vld [vmem:[#allocation2 + $0x1e8] ss:$16 sps:$4 sm:$0xff]  }
  0x84   :  { %1816 = vmatprep.subr.bf16.mxu1 %v3401_v57  ;;  %v3483_v57 = vld [vmem:[#allocation2 + $0x3e8] ss:$16 sps:$4 sm:$0xff]  }
  0x86   :  { %1774 = vmatpush2.bf16.msra.mxu0 %v3396_v58  ;;  %v3488_v58 = vld [vmem:[#allocation2 + $0x1cc] ss:$16 sps:$4 sm:$0xff]  }
  0x87   :  { %1817 = vmatpush2.bf16.msra.mxu1 %v3399_v59  ;;  %1775 = vmatprep.subr.bf16.mxu0 %v3404_v60  ;;  %v3491_v59 = vld [vmem:[#allocation2 + $0x3cc] ss:$16 sps:$4 sm:$0xff]   ;;  %v3486_v60 = vld [vmem:[#allocation2 + $0x1c8] ss:$16 sps:$4 sm:$0xff]  }
  0x88   :  { %1818 = vmatprep.subr.bf16.mxu1 %v3407_v61  ;;  %v3489_v61 = vld [vmem:[#allocation2 + $0x3c8] ss:$16 sps:$4 sm:$0xff]  }
  0x8a   :  { %1776 = vmatpush2.bf16.msra.mxu0 %v3402_v62  ;;  %v3494_v62 = vld [vmem:[#allocation2 + $0x1ac] ss:$16 sps:$4 sm:$0xff]  }
  0x8b   :  { %1819 = vmatpush2.bf16.msra.mxu1 %v3405_v63  ;;  %1777 = vmatprep.subr.bf16.mxu0 %v3410_v0  ;;  %v3497_v63 = vld [vmem:[#allocation2 + $0x3ac] ss:$16 sps:$4 sm:$0xff]   ;;  %v3492_v0 = vld [vmem:[#allocation2 + $0x1a8] ss:$16 sps:$4 sm:$0xff]  }
  0x8c   :  { %1820 = vmatprep.subr.bf16.mxu1 %v3413_v1  ;;  %v3495_v1 = vld [vmem:[#allocation2 + $0x3a8] ss:$16 sps:$4 sm:$0xff]  }
  0x8e   :  { %1778 = vmatpush2.bf16.msra.mxu0 %v3408_v2  ;;  %v3500_v2 = vld [vmem:[#allocation2 + $0x18c] ss:$16 sps:$4 sm:$0xff]  }
  0x8f   :  { %1821 = vmatpush2.bf16.msra.mxu1 %v3411_v3  ;;  %1779 = vmatprep.subr.bf16.mxu0 %v3416_v4  ;;  %v3503_v3 = vld [vmem:[#allocation2 + $0x38c] ss:$16 sps:$4 sm:$0xff]   ;;  %v3498_v4 = vld [vmem:[#allocation2 + $0x188] ss:$16 sps:$4 sm:$0xff]  }
  0x90   :  { %1822 = vmatprep.subr.bf16.mxu1 %v3419_v5  ;;  %v3501_v5 = vld [vmem:[#allocation2 + $0x388] ss:$16 sps:$4 sm:$0xff]  }
  0x92   :  { %1780 = vmatpush2.bf16.msra.mxu0 %v3414_v6  ;;  %v3506_v6 = vld [vmem:[#allocation2 + $0x16c] ss:$16 sps:$4 sm:$0xff]  }
  0x93   :  { %1823 = vmatpush2.bf16.msra.mxu1 %v3417_v7  ;;  %1781 = vmatprep.subr.bf16.mxu0 %v3422_v10  ;;  %v3509_v7 = vld [vmem:[#allocation2 + $0x36c] ss:$16 sps:$4 sm:$0xff]   ;;  %v3504_v10 = vld [vmem:[#allocation2 + $0x168] ss:$16 sps:$4 sm:$0xff]  }
  0x94   :  { %1824 = vmatprep.subr.bf16.mxu1 %v3425_v11  ;;  %v3507_v11 = vld [vmem:[#allocation2 + $0x368] ss:$16 sps:$4 sm:$0xff]  }
  0x96   :  { %1782 = vmatpush2.bf16.msra.mxu0 %v3420_v12  ;;  %v3512_v12 = vld [vmem:[#allocation2 + $0x14c] ss:$16 sps:$4 sm:$0xff]  }
  0x97   :  { %1825 = vmatpush2.bf16.msra.mxu1 %v3423_v13  ;;  %1783 = vmatprep.subr.bf16.mxu0 %v3428_v14  ;;  %v3515_v13 = vld [vmem:[#allocation2 + $0x34c] ss:$16 sps:$4 sm:$0xff]   ;;  %v3510_v14 = vld [vmem:[#allocation2 + $0x148] ss:$16 sps:$4 sm:$0xff]  }
  0x98   :  { %1826 = vmatprep.subr.bf16.mxu1 %v3431_v15  ;;  %v3513_v15 = vld [vmem:[#allocation2 + $0x348] ss:$16 sps:$4 sm:$0xff]  }
  0x9a   :  { %1784 = vmatpush2.bf16.msra.mxu0 %v3426_v16  ;;  %v3518_v16 = vld [vmem:[#allocation2 + $0x12c] ss:$16 sps:$4 sm:$0xff]  }
  0x9b   :  { %1827 = vmatpush2.bf16.msra.mxu1 %v3429_v17  ;;  %1839 = vmatprep.subr.bf16.mxu0 %v3434_v18  ;;  %v3521_v17 = vld [vmem:[#allocation2 + $0x32c] ss:$16 sps:$4 sm:$0xff]   ;;  %v3516_v18 = vld [vmem:[#allocation2 + $0x128] ss:$16 sps:$4 sm:$0xff]  }
  0x9c   :  { %1882 = vmatprep.subr.bf16.mxu1 %v3437_v19  ;;  %v3519_v19 = vld [vmem:[#allocation2 + $0x328] ss:$16 sps:$4 sm:$0xff]  }
  0x9d   :  { %1786 = vmatmul.mubr.bf16.vlgmr.msra.gmra.mxu0 %v3908_v20 }
  0x9e   :  { %1829 = vmatmul.mubr.bf16.vlgmr.msra.gmra.mxu1 %v3912_v21  ;;  %1840 = vmatpush1.bf16.msra.mxu0 %v3432_v22  ;;  %v3524_v22 = vld [vmem:[#allocation2 + $0x10c] ss:$16 sps:$4 sm:$0xff]  }
  0x9f   :  { %1883 = vmatpush1.bf16.msra.mxu1 %v3435_v23  ;;  %1841 = vmatprep.subr.bf16.mxu0 %v3440_v24  ;;  %v3527_v23 = vld [vmem:[#allocation2 + $0x30c] ss:$16 sps:$4 sm:$0xff]   ;;  %v3522_v24 = vld [vmem:[#allocation2 + $0x108] ss:$16 sps:$4 sm:$0xff]  }
  0xa0   :  { %1884 = vmatprep.subr.bf16.mxu1 %v3443_v25  ;;  %1871 = vmatprep.mubr.bf16.mxu0 %v3864_v53  ;;  %v3459_v53 = vld [vmem:[#allocation2 + $0x268] ss:$16 sps:$4 sm:$0xff]  }
  0xa1   :  { %1914 = vmatprep.mubr.bf16.mxu1 %v3866_v55  ;;  %v3464_v55 = vld [vmem:[#allocation2 + $0x4c] ss:$16 sps:$4 sm:$0xff]   ;;  %v3525_v25 = vld [vmem:[#allocation2 + $0x308] ss:$16 sps:$4 sm:$0xff]  }
  0xa2   :  { %1842 = vmatpush1.bf16.msra.mxu0 %v3438_v26  ;;  %v3530_v26 = vld [vmem:[#allocation2 + $0x4ec] ss:$16 sps:$4 sm:$0xff]  }
  0xa3   :  { %1885 = vmatpush1.bf16.msra.mxu1 %v3441_v27  ;;  %1843 = vmatprep.subr.bf16.mxu0 %v3446_v28  ;;  %v3533_v27 = vld [vmem:[#allocation2 + $0x6ec] ss:$16 sps:$4 sm:$0xff]   ;;  %v3528_v28 = vld [vmem:[#allocation2 + $0x4e8] ss:$16 sps:$4 sm:$0xff]  }
  0xa4   :  { %1886 = vmatprep.subr.bf16.mxu1 %v3449_v29  ;;  %v3531_v29 = vld [vmem:[#allocation2 + $0x6e8] ss:$16 sps:$4 sm:$0xff]  }
  0xa6   :  { %1844 = vmatpush1.bf16.msra.mxu0 %v3444_v30  ;;  %v3536_v30 = vld [vmem:[#allocation2 + $0x4cc] ss:$16 sps:$4 sm:$0xff]  }
  0xa7   :  { %1887 = vmatpush1.bf16.msra.mxu1 %v3447_v31  ;;  %1845 = vmatprep.subr.bf16.mxu0 %v3452_v32  ;;  %v3539_v31 = vld [vmem:[#allocation2 + $0x6cc] ss:$16 sps:$4 sm:$0xff]   ;;  %v3534_v32 = vld [vmem:[#allocation2 + $0x4c8] ss:$16 sps:$4 sm:$0xff]  }
  0xa8   :  { %1888 = vmatprep.subr.bf16.mxu1 %v3455_v33  ;;  %v3537_v33 = vld [vmem:[#allocation2 + $0x6c8] ss:$16 sps:$4 sm:$0xff]  }
  0xaa   :  { %1846 = vmatpush1.bf16.msra.mxu0 %v3450_v34  ;;  %v3542_v34 = vld [vmem:[#allocation2 + $0x4ac] ss:$16 sps:$4 sm:$0xff]  }
  0xab   :  { %1889 = vmatpush1.bf16.msra.mxu1 %v3453_v35  ;;  %1847 = vmatprep.subr.bf16.mxu0 %v3458_v36  ;;  %v3545_v35 = vld [vmem:[#allocation2 + $0x6ac] ss:$16 sps:$4 sm:$0xff]   ;;  %v3540_v36 = vld [vmem:[#allocation2 + $0x4a8] ss:$16 sps:$4 sm:$0xff]  }
  0xac   :  { %1890 = vmatprep.subr.bf16.mxu1 %v3461_v37  ;;  %v3543_v37 = vld [vmem:[#allocation2 + $0x6a8] ss:$16 sps:$4 sm:$0xff]  }
  0xae   :  { %1848 = vmatpush1.bf16.msra.mxu0 %v3456_v38  ;;  %v3548_v38 = vld [vmem:[#allocation2 + $0x48c] ss:$16 sps:$4 sm:$0xff]  }
  0xaf   :  { %1891 = vmatpush1.bf16.msra.mxu1 %v3459_v53  ;;  %1849 = vmatprep.subr.bf16.mxu0 %v3464_v55  ;;  %v3546_v53 = vld [vmem:[#allocation2 + $0x488] ss:$16 sps:$4 sm:$0xff]   ;;  %v3554_v55 = vld [vmem:[#allocation2 + $0x46c] ss:$16 sps:$4 sm:$0xff]  }
  0xb0   :  { %1892 = vmatprep.subr.bf16.mxu1 %v3467_v39  ;;  %v3557_v39 = vld [vmem:[#allocation2 + $0x66c] ss:$16 sps:$4 sm:$0xff]  }
  0xb2   :  { %1850 = vmatpush1.bf16.msra.mxu0 %v3462_v40  ;;  %v3552_v40 = vld [vmem:[#allocation2 + $0x468] ss:$16 sps:$4 sm:$0xff]  }
  0xb3   :  { %1893 = vmatpush1.bf16.msra.mxu1 %v3465_v42  ;;  %1851 = vmatprep.subr.bf16.mxu0 %v3470_v44  ;;  %v3555_v42 = vld [vmem:[#allocation2 + $0x668] ss:$16 sps:$4 sm:$0xff]   ;;  %v3560_v44 = vld [vmem:[#allocation2 + $0x44c] ss:$16 sps:$4 sm:$0xff]  }
  0xb4   :  { %1894 = vmatprep.subr.bf16.mxu1 %v3473_v45  ;;  %v3561_v45 = vld [vmem:[#allocation2 + $0x648] ss:$16 sps:$4 sm:$0xff]  }
  0xb6   :  { %1852 = vmatpush1.bf16.msra.mxu0 %v3468_v46  ;;  %v3566_v46 = vld [vmem:[#allocation2 + $0x42c] ss:$16 sps:$4 sm:$0xff]  }
  0xb7   :  { %1895 = vmatpush1.bf16.msra.mxu1 %v3471_v47  ;;  %1853 = vmatprep.subr.bf16.mxu0 %v3476_v48  ;;  %v3569_v47 = vld [vmem:[#allocation2 + $0x62c] ss:$16 sps:$4 sm:$0xff]   ;;  %v3564_v48 = vld [vmem:[#allocation2 + $0x428] ss:$16 sps:$4 sm:$0xff]  }
  0xb8   :  { %1896 = vmatprep.subr.bf16.mxu1 %v3479_v49  ;;  %v3567_v49 = vld [vmem:[#allocation2 + $0x628] ss:$16 sps:$4 sm:$0xff]  }
  0xba   :  { %1854 = vmatpush1.bf16.msra.mxu0 %v3474_v50  ;;  %v3572_v50 = vld [vmem:[#allocation2 + $0x40c] ss:$16 sps:$4 sm:$0xff]  }
  0xbb   :  { %1897 = vmatpush1.bf16.msra.mxu1 %v3477_v51  ;;  %1855 = vmatprep.subr.bf16.mxu0 %v3482_v52  ;;  %v3575_v51 = vld [vmem:[#allocation2 + $0x60c] ss:$16 sps:$4 sm:$0xff]   ;;  %v3570_v52 = vld [vmem:[#allocation2 + $0x408] ss:$16 sps:$4 sm:$0xff]  }
  0xbc   :  { %1898 = vmatprep.subr.bf16.mxu1 %v3485_v54  ;;  %v3573_v54 = vld [vmem:[#allocation2 + $0x608] ss:$16 sps:$4 sm:$0xff]  }
  0xbe   :  { %1856 = vmatpush2.bf16.msra.mxu0 %v3480_v56  ;;  %v3578_v56 = vld [vmem:[#allocation2 + $0x5ec] ss:$16 sps:$4 sm:$0xff]  }
  0xbf   :  { %1899 = vmatpush2.bf16.msra.mxu1 %v3483_v57  ;;  %1857 = vmatprep.subr.bf16.mxu0 %v3488_v58  ;;  %v3581_v57 = vld [vmem:[#allocation2 + $0x7ec] ss:$16 sps:$4 sm:$0xff]   ;;  %v3576_v58 = vld [vmem:[#allocation2 + $0x5e8] ss:$16 sps:$4 sm:$0xff]  }
  0xc0   :  { %1900 = vmatprep.subr.bf16.mxu1 %v3491_v59  ;;  %v3579_v59 = vld [vmem:[#allocation2 + $0x7e8] ss:$16 sps:$4 sm:$0xff]  }
  0xc2   :  { %1858 = vmatpush2.bf16.msra.mxu0 %v3486_v60  ;;  %v3584_v60 = vld [vmem:[#allocation2 + $0x5cc] ss:$16 sps:$4 sm:$0xff]  }
  0xc3   :  { %1901 = vmatpush2.bf16.msra.mxu1 %v3489_v61  ;;  %1859 = vmatprep.subr.bf16.mxu0 %v3494_v62  ;;  %v3587_v61 = vld [vmem:[#allocation2 + $0x7cc] ss:$16 sps:$4 sm:$0xff]   ;;  %v3582_v62 = vld [vmem:[#allocation2 + $0x5c8] ss:$16 sps:$4 sm:$0xff]  }
  0xc4   :  { %1902 = vmatprep.subr.bf16.mxu1 %v3497_v63  ;;  %v3585_v63 = vld [vmem:[#allocation2 + $0x7c8] ss:$16 sps:$4 sm:$0xff]  }
  0xc6   :  { %1860 = vmatpush2.bf16.msra.mxu0 %v3492_v0  ;;  %v3590_v0 = vld [vmem:[#allocation2 + $0x5ac] ss:$16 sps:$4 sm:$0xff]  }
  0xc7   :  { %1903 = vmatpush2.bf16.msra.mxu1 %v3495_v1  ;;  %1861 = vmatprep.subr.bf16.mxu0 %v3500_v2  ;;  %v3593_v1 = vld [vmem:[#allocation2 + $0x7ac] ss:$16 sps:$4 sm:$0xff]   ;;  %v3588_v2 = vld [vmem:[#allocation2 + $0x5a8] ss:$16 sps:$4 sm:$0xff]  }
  0xc8   :  { %1904 = vmatprep.subr.bf16.mxu1 %v3503_v3  ;;  %v3591_v3 = vld [vmem:[#allocation2 + $0x7a8] ss:$16 sps:$4 sm:$0xff]  }
  0xca   :  { %1862 = vmatpush2.bf16.msra.mxu0 %v3498_v4  ;;  %v3596_v4 = vld [vmem:[#allocation2 + $0x58c] ss:$16 sps:$4 sm:$0xff]  }
  0xcb   :  { %1905 = vmatpush2.bf16.msra.mxu1 %v3501_v5  ;;  %1863 = vmatprep.subr.bf16.mxu0 %v3506_v6  ;;  %v3599_v5 = vld [vmem:[#allocation2 + $0x78c] ss:$16 sps:$4 sm:$0xff]   ;;  %v3594_v6 = vld [vmem:[#allocation2 + $0x588] ss:$16 sps:$4 sm:$0xff]  }
  0xcc   :  { %1906 = vmatprep.subr.bf16.mxu1 %v3509_v7  ;;  %v3597_v7 = vld [vmem:[#allocation2 + $0x788] ss:$16 sps:$4 sm:$0xff]  }
  0xce   :  { %1864 = vmatpush2.bf16.msra.mxu0 %v3504_v10  ;;  %v3602_v10 = vld [vmem:[#allocation2 + $0x56c] ss:$16 sps:$4 sm:$0xff]  }
  0xcf   :  { %1907 = vmatpush2.bf16.msra.mxu1 %v3507_v11  ;;  %1865 = vmatprep.subr.bf16.mxu0 %v3512_v12  ;;  %v3605_v11 = vld [vmem:[#allocation2 + $0x76c] ss:$16 sps:$4 sm:$0xff]   ;;  %v3600_v12 = vld [vmem:[#allocation2 + $0x568] ss:$16 sps:$4 sm:$0xff]  }
  0xd0   :  { %1908 = vmatprep.subr.bf16.mxu1 %v3515_v13  ;;  %v3603_v13 = vld [vmem:[#allocation2 + $0x768] ss:$16 sps:$4 sm:$0xff]  }
  0xd2   :  { %1866 = vmatpush2.bf16.msra.mxu0 %v3510_v14  ;;  %v3608_v14 = vld [vmem:[#allocation2 + $0x54c] ss:$16 sps:$4 sm:$0xff]  }
  0xd3   :  { %1909 = vmatpush2.bf16.msra.mxu1 %v3513_v15  ;;  %1867 = vmatprep.subr.bf16.mxu0 %v3518_v16  ;;  %v3611_v15 = vld [vmem:[#allocation2 + $0x74c] ss:$16 sps:$4 sm:$0xff]   ;;  %v3606_v16 = vld [vmem:[#allocation2 + $0x548] ss:$16 sps:$4 sm:$0xff]  }
  0xd4   :  { %1910 = vmatprep.subr.bf16.mxu1 %v3521_v17  ;;  %v3609_v17 = vld [vmem:[#allocation2 + $0x748] ss:$16 sps:$4 sm:$0xff]  }
  0xd6   :  { %1868 = vmatpush2.bf16.msra.mxu0 %v3516_v18  ;;  %v3614_v18 = vld [vmem:[#allocation2 + $0x52c] ss:$16 sps:$4 sm:$0xff]  }
  0xd7   :  { %1911 = vmatpush2.bf16.msra.mxu1 %v3519_v19  ;;  %1869 = vmatprep.subr.bf16.mxu0 %v3524_v22  ;;  %v3617_v19 = vld [vmem:[#allocation2 + $0x72c] ss:$16 sps:$4 sm:$0xff]   ;;  %v3612_v22 = vld [vmem:[#allocation2 + $0x528] ss:$16 sps:$4 sm:$0xff]  }
  0xd8   :  { %1912 = vmatprep.subr.bf16.mxu1 %v3527_v23  ;;  %v3615_v23 = vld [vmem:[#allocation2 + $0x728] ss:$16 sps:$4 sm:$0xff]  }
  0xda   :  { %1870 = vmatpush2.bf16.msra.mxu0 %v3522_v24  ;;  %v3620_v24 = vld [vmem:[#allocation2 + $0x50c] ss:$16 sps:$4 sm:$0xff]  }
  0xdb   :  { %1913 = vmatpush2.bf16.msra.mxu1 %v3525_v25  ;;  %1925 = vmatprep.subr.bf16.mxu0 %v3530_v26  ;;  %v3623_v25 = vld [vmem:[#allocation2 + $0x70c] ss:$16 sps:$4 sm:$0xff]   ;;  %v3618_v26 = vld [vmem:[#allocation2 + $0x508] ss:$16 sps:$4 sm:$0xff]  }
  0xdc   :  { %1968 = vmatprep.subr.bf16.mxu1 %v3533_v27  ;;  %v3621_v27 = vld [vmem:[#allocation2 + $0x708] ss:$16 sps:$4 sm:$0xff]  }
  0xdd   :  { %1872 = vmatmul.mubr.bf16.vlgmr.msra.gmra.mxu0 %v3870_v8  ;;  %v3551_v8 = vld [vmem:[#allocation2 + $0x68c] ss:$16 sps:$4 sm:$0xff]  }
  0xde   :  { %1915 = vmatmul.mubr.bf16.vlgmr.msra.gmra.mxu1 %v3872_v9  ;;  %1926 = vmatpush1.bf16.msra.mxu0 %v3528_v28  ;;  %v3549_v9 = vld [vmem:[#allocation2 + $0x688] ss:$16 sps:$4 sm:$0xff]   ;;  %v3626_v28 = vld [vmem:[#allocation4 + $0x74] ss:$8 sps:$4 sm:$0xff]  }
  0xdf   :  { %1969 = vmatpush1.bf16.msra.mxu1 %v3531_v29  ;;  %1927 = vmatprep.subr.bf16.mxu0 %v3536_v30  ;;  %v3624_v29 = vld [vmem:[#allocation4 + $0x70] ss:$8 sps:$4 sm:$0xff]   ;;  %v3629_v30 = vld [vmem:[#allocation4 + $0x64] ss:$8 sps:$4 sm:$0xff]  }
  0xe0   :  { %1970 = vmatprep.subr.bf16.mxu1 %v3539_v31  ;;  %1957 = vmatprep.mubr.bf16.mxu0 %v3898_v41  ;;  %v3563_v41 = vld [vmem:[#allocation2 + $0x64c] ss:$16 sps:$4 sm:$0xff]   ;;  %v3627_v31 = vld [vmem:[#allocation4 + $0x60] ss:$8 sps:$4 sm:$0xff]  }
  0xe1   :  { %2000 = vmatprep.mubr.bf16.mxu1 %v3902_v43  ;;  %v3558_v43 = vld [vmem:[#allocation2 + $0x448] ss:$16 sps:$4 sm:$0xff]  }
  0xe2   :  { %1928 = vmatpush1.bf16.msra.mxu0 %v3534_v32  ;;  %v3632_v32 = vld [vmem:[#allocation4 + $0x54] ss:$8 sps:$4 sm:$0xff]  }
  0xe3   :  { %1971 = vmatpush1.bf16.msra.mxu1 %v3537_v33  ;;  %1929 = vmatprep.subr.bf16.mxu0 %v3542_v34  ;;  %v3630_v33 = vld [vmem:[#allocation4 + $0x50] ss:$8 sps:$4 sm:$0xff]   ;;  %v3635_v34 = vld [vmem:[#allocation4 + $0x44] ss:$8 sps:$4 sm:$0xff]  }
  0xe4   :  { %1972 = vmatprep.subr.bf16.mxu1 %v3545_v35  ;;  %v3633_v35 = vld [vmem:[#allocation4 + $0x40] ss:$8 sps:$4 sm:$0xff]  }
  0xe6   :  { %1930 = vmatpush1.bf16.msra.mxu0 %v3540_v36  ;;  %v3672_v36 = vld [vmem:[#allocation4 + $0x170] ss:$8 sps:$4 sm:$0xff]  }
  0xe7   :  { %1973 = vmatpush1.bf16.msra.mxu1 %v3543_v37  ;;  %1931 = vmatprep.subr.bf16.mxu0 %v3548_v38  ;;  %v3674_v37 = vld [vmem:[#allocation4 + $0x174] ss:$8 sps:$4 sm:$0xff]  }
  0xe8   :  { %1974 = vmatprep.subr.bf16.mxu1 %v3551_v8  ;;  %v3638_v38 = vld [vmem:[#allocation4 + $0x34] ss:$8 sps:$4 sm:$0xff]   ;;  %v3677_v8 = vld [vmem:[#allocation4 + $0x164] ss:$8 sps:$4 sm:$0xff]  }
  0xea   :  { %1932 = vmatpush1.bf16.msra.mxu0 %v3546_v53  ;;  %v3680_v53 = vld [vmem:[#allocation4 + $0x154] ss:$8 sps:$4 sm:$0xff]  }
  0xeb   :  { %1975 = vmatpush1.bf16.msra.mxu1 %v3549_v9  ;;  %1933 = vmatprep.subr.bf16.mxu0 %v3554_v55  ;;  %v3641_v9 = vld [vmem:[#allocation4 + $0x24] ss:$8 sps:$4 sm:$0xff]   ;;  %v3678_v55 = vld [vmem:[#allocation4 + $0x150] ss:$8 sps:$4 sm:$0xff]  }
  0xec   :  { %1976 = vmatprep.subr.bf16.mxu1 %v3557_v39  ;;  %v3639_v39 = vld [vmem:[#allocation4 + $0x20] ss:$8 sps:$4 sm:$0xff]  }
  0xee   :  { %1934 = vmatpush1.bf16.msra.mxu0 %v3552_v40  ;;  %v3683_v40 = vld [vmem:[#allocation4 + $0x144] ss:$8 sps:$4 sm:$0xff]  }
  0xef   :  { %1977 = vmatpush1.bf16.msra.mxu1 %v3555_v42  ;;  %1935 = vmatprep.subr.bf16.mxu0 %v3560_v44  ;;  %v3644_v42 = vld [vmem:[#allocation4 + $0x14] ss:$8 sps:$4 sm:$0xff]   ;;  %v3681_v44 = vld [vmem:[#allocation4 + $0x140] ss:$8 sps:$4 sm:$0xff]  }
  0xf0   :  { %1978 = vmatprep.subr.bf16.mxu1 %v3563_v41  ;;  %v3642_v41 = vld [vmem:[#allocation4 + $0x10] ss:$8 sps:$4 sm:$0xff]  }
  0xf2   :  { %1936 = vmatpush1.bf16.msra.mxu0 %v3558_v43  ;;  %v3686_v43 = vld [vmem:[#allocation4 + $0x134] ss:$8 sps:$4 sm:$0xff]  }
  0xf3   :  { %1979 = vmatpush1.bf16.msra.mxu1 %v3561_v45  ;;  %1937 = vmatprep.subr.bf16.mxu0 %v3566_v46  ;;  %v3647_v45 = vld [vmem:[#allocation4 + $0x4] ss:$8 sps:$4 sm:$0xff]   ;;  %v3684_v46 = vld [vmem:[#allocation4 + $0x130] ss:$8 sps:$4 sm:$0xff]  }
  0xf4   :  { %1980 = vmatprep.subr.bf16.mxu1 %v3569_v47  ;;  %v3645_v47 = vld [vmem:[#allocation4] ss:$8 sps:$4 sm:$0xff]  }
  0xf6   :  { %1938 = vmatpush1.bf16.msra.mxu0 %v3564_v48  ;;  %v3689_v48 = vld [vmem:[#allocation4 + $0x124] ss:$8 sps:$4 sm:$0xff]  }
  0xf7   :  { %1981 = vmatpush1.bf16.msra.mxu1 %v3567_v49  ;;  %1939 = vmatprep.subr.bf16.mxu0 %v3572_v50  ;;  %v3650_v49 = vld [vmem:[#allocation4 + $0xf4] ss:$8 sps:$4 sm:$0xff]   ;;  %v3687_v50 = vld [vmem:[#allocation4 + $0x120] ss:$8 sps:$4 sm:$0xff]  }
  0xf8   :  { %1982 = vmatprep.subr.bf16.mxu1 %v3575_v51  ;;  %v3648_v51 = vld [vmem:[#allocation4 + $0xf0] ss:$8 sps:$4 sm:$0xff]  }
  0xfa   :  { %1940 = vmatpush1.bf16.msra.mxu0 %v3570_v52  ;;  %v3692_v52 = vld [vmem:[#allocation4 + $0x114] ss:$8 sps:$4 sm:$0xff]  }
  0xfb   :  { %1983 = vmatpush1.bf16.msra.mxu1 %v3573_v54  ;;  %1941 = vmatprep.subr.bf16.mxu0 %v3578_v56  ;;  %v3653_v54 = vld [vmem:[#allocation4 + $0xe4] ss:$8 sps:$4 sm:$0xff]   ;;  %v3690_v56 = vld [vmem:[#allocation4 + $0x110] ss:$8 sps:$4 sm:$0xff]  }
  0xfc   :  { %1984 = vmatprep.subr.bf16.mxu1 %v3581_v57  ;;  %v3651_v57 = vld [vmem:[#allocation4 + $0xe0] ss:$8 sps:$4 sm:$0xff]  }
  0xfe   :  { %1942 = vmatpush2.bf16.msra.mxu0 %v3576_v58  ;;  %v3695_v58 = vld [vmem:[#allocation4 + $0x104] ss:$8 sps:$4 sm:$0xff]  }
  0xff   :  { %1985 = vmatpush2.bf16.msra.mxu1 %v3579_v59  ;;  %1943 = vmatprep.subr.bf16.mxu0 %v3584_v60  ;;  %v3656_v59 = vld [vmem:[#allocation4 + $0xd4] ss:$8 sps:$4 sm:$0xff]   ;;  %v3693_v60 = vld [vmem:[#allocation4 + $0x100] ss:$8 sps:$4 sm:$0xff]  }
 0x100   :  { %1986 = vmatprep.subr.bf16.mxu1 %v3587_v61  ;;  %v3654_v61 = vld [vmem:[#allocation4 + $0xd0] ss:$8 sps:$4 sm:$0xff]  }
 0x102   :  { %1944 = vmatpush2.bf16.msra.mxu0 %v3582_v62  ;;  %v3698_v62 = vld [vmem:[#allocation4 + $0x1f4] ss:$8 sps:$4 sm:$0xff]  }
 0x103   :  { %1987 = vmatpush2.bf16.msra.mxu1 %v3585_v63  ;;  %1945 = vmatprep.subr.bf16.mxu0 %v3590_v0  ;;  %v3659_v63 = vld [vmem:[#allocation4 + $0xc4] ss:$8 sps:$4 sm:$0xff]   ;;  %v3696_v0 = vld [vmem:[#allocation4 + $0x1f0] ss:$8 sps:$4 sm:$0xff]  }
 0x104   :  { %1988 = vmatprep.subr.bf16.mxu1 %v3593_v1  ;;  %v3657_v1 = vld [vmem:[#allocation4 + $0xc0] ss:$8 sps:$4 sm:$0xff]  }
 0x106   :  { %1946 = vmatpush2.bf16.msra.mxu0 %v3588_v2  ;;  %v3701_v2 = vld [vmem:[#allocation4 + $0x1e4] ss:$8 sps:$4 sm:$0xff]  }
 0x107   :  { %1989 = vmatpush2.bf16.msra.mxu1 %v3591_v3  ;;  %1947 = vmatprep.subr.bf16.mxu0 %v3596_v4  ;;  %v3662_v3 = vld [vmem:[#allocation4 + $0xb4] ss:$8 sps:$4 sm:$0xff]   ;;  %v3699_v4 = vld [vmem:[#allocation4 + $0x1e0] ss:$8 sps:$4 sm:$0xff]  }
 0x108   :  { %1990 = vmatprep.subr.bf16.mxu1 %v3599_v5  ;;  %v327_v5 = vlaneseq }
 0x10a   :  { %1948 = vmatpush2.bf16.msra.mxu0 %v3594_v6  ;;  %v3660_v6 = vld [vmem:[#allocation4 + $0xb0] ss:$8 sps:$4 sm:$0xff]  }
 0x10b   :  { %1991 = vmatpush2.bf16.msra.mxu1 %v3597_v7  ;;  %1949 = vmatprep.subr.bf16.mxu0 %v3602_v10  ;;  %v3704_v7 = vld [vmem:[#allocation4 + $0x1d4] ss:$8 sps:$4 sm:$0xff]   ;;  %v3665_v10 = vld [vmem:[#allocation4 + $0xa4] ss:$8 sps:$4 sm:$0xff]  }
 0x10c   :  { %1992 = vmatprep.subr.bf16.mxu1 %v3605_v11  ;;  %v3702_v11 = vld [vmem:[#allocation4 + $0x1d0] ss:$8 sps:$4 sm:$0xff]  }
 0x10e   :  { %1950 = vmatpush2.bf16.msra.mxu0 %v3600_v12  ;;  %v3924_v12 = vshrl.u32 %v327_v5, 7  ;;  %v3720_v5 = vld [vmem:[%s4036_s5 + $0x78] sm:$0xff]  }
 0x10f   :  { %1993 = vmatpush2.bf16.msra.mxu1 %v3603_v13  ;;  %1951 = vmatprep.subr.bf16.mxu0 %v3608_v14  ;;  %v3663_v13 = vld [vmem:[#allocation4 + $0xa0] ss:$8 sps:$4 sm:$0xff]   ;;  %v3707_v14 = vld [vmem:[#allocation4 + $0x1c4] ss:$8 sps:$4 sm:$0xff]  }
 0x110   :  { %1994 = vmatprep.subr.bf16.mxu1 %v3611_v15 }
 0x112   :  { %1952 = vmatpush2.bf16.msra.mxu0 %v3606_v16 }
 0x113   :  { %1995 = vmatpush2.bf16.msra.mxu1 %v3609_v17  ;;  %1953 = vmatprep.subr.bf16.mxu0 %v3614_v18  ;;  %v3668_v17 = vld [vmem:[#allocation4 + $0x94] ss:$8 sps:$4 sm:$0xff]   ;;  %v3705_v18 = vld [vmem:[#allocation4 + $0x1c0] ss:$8 sps:$4 sm:$0xff]  }
 0x114   :  { %1996 = vmatprep.subr.bf16.mxu1 %v3617_v19  ;;  %v333_v19 = vsub.s32 1, %v3924_v12 }
 0x116   :  { %1954 = vmatpush2.bf16.msra.mxu0 %v3612_v22  ;;  %v3666_v22 = vld [vmem:[#allocation4 + $0x90] ss:$8 sps:$4 sm:$0xff]  }
 0x117   :  { %1997 = vmatpush2.bf16.msra.mxu1 %v3615_v23  ;;  %1955 = vmatprep.subr.bf16.mxu0 %v3620_v24  ;;  %v3930_v23 = vld [vmem:[%s4033_s2] sm:$0xf]  ;;  %v329_v24 = vsub.s32 0, %v3924_v12 }
 0x118   :  { %1998 = vmatprep.subr.bf16.mxu1 %v3623_v25 }
 0x11a   :  { %1956 = vmatpush2.bf16.msra.mxu0 %v3618_v26 }
 0x11b   :  { %1999 = vmatpush2.bf16.msra.mxu1 %v3621_v27  ;;  %2419 = vmatprep.subr.bf16.mxu0 %v3626_v28  ;;  %v3671_v27 = vld [vmem:[#allocation4 + $0x84] ss:$8 sps:$4 sm:$0xff]   ;;  %v334_v28 = vrot.slane %v3930_v23, %v333_v19 }
 0x11c   :  { %2462 = vmatprep.subr.bf16.mxu1 %v3674_v37  ;;  %v3710_v37 = vld [vmem:[#allocation4 + $0x1b4] ss:$8 sps:$4 sm:$0xff]  }
 0x11d   :  { %1958 = vmatmul.mubr.bf16.vlgmr.msra.gmra.mxu0 %v3908_v20  ;;  %v3675_v20 = vld [vmem:[#allocation4 + $0x160] ss:$8 sps:$4 sm:$0xff]   ;;  %v1701_v15 = vpop.f32.mrf.mxu0 }
 0x11e   :  { %2001 = vmatmul.mubr.bf16.vlgmr.msra.gmra.mxu1 %v3912_v21  ;;  %2420 = vmatpush1.bf16.msra.mxu0 %v3624_v29  ;;  %v3636_v21 = vld [vmem:[#allocation4 + $0x30] ss:$8 sps:$4 sm:$0xff]   ;;  %v1744_v16 = vpop.f32.mrf.mxu1  ;;  %v3669_v29 = vld [vmem:[#allocation4 + $0x80] ss:$8 sps:$4 sm:$0xff]  }
 0x11f   :  { %2421 = vmatprep.subr.bf16.mxu0 %v3629_v30  ;;  %2463 = vmatpush1.bf16.msra.mxu1 %v3672_v36  ;;  %v1703_v25 = vpop.f32.mrf.mxu0  ;;  %v330_v30 = vrot.slane %v3930_v23, %v329_v24 }
 0x120   :  { %2464 = vmatprep.subr.bf16.mxu1 %v3677_v8  ;;  %v1746_v26 = vpop.f32.mrf.mxu1  ;;  %v3708_v8 = vld [vmem:[#allocation4 + $0x1b0] ss:$8 sps:$4 sm:$0xff]  }
 0x122   :  { %2422 = vmatpush1.bf16.msra.mxu0 %v3627_v31  ;;  %v1705_v31 = vpop.f32.mrf.mxu0 }
 0x123   :  { %2423 = vmatprep.subr.bf16.mxu0 %v3632_v32  ;;  %2465 = vmatpush1.bf16.msra.mxu1 %v3675_v20  ;;  %v1748_v32 = vpop.f32.mrf.mxu1 }
 0x124   :  { %2466 = vmatprep.subr.bf16.mxu1 %v3680_v53 }
 0x125   :  { %v1750_v36 = vpop.f32.mrf.mxu1 }
 0x126   :  { %2424 = vmatpush1.bf16.msra.mxu0 %v3630_v33  ;;  %v1704_v33 = vadd.f32 %v1703_v25, %v334_v28  ;;  %v341_v25 = vsub.s32 3, %v3924_v12 }
 0x127   :  { %2425 = vmatprep.subr.bf16.mxu0 %v3635_v34  ;;  %2467 = vmatpush1.bf16.msra.mxu1 %v3678_v55  ;;  %v1702_v34 = vadd.f32 %v1701_v15, %v330_v30  ;;  %v3727_v15 = vld [vmem:[%s4036_s5 + $0x20] sm:$0xff]  }
 0x128   :  { %2468 = vmatprep.subr.bf16.mxu1 %v3683_v40  ;;  %v1747_v53 = vadd.f32 %v1746_v26, %v1704_v33  ;;  %v337_v26 = vsub.s32 2, %v3924_v12 }
 0x129   :  { %v1745_v55 = vadd.f32 %v1744_v16, %v1702_v34  ;;  %v3728_v16 = vld [vmem:[%s4036_s5 + $0x58] sm:$0xff]  }
 0x12a   :  { %2426 = vmatpush1.bf16.msra.mxu0 %v3633_v35  ;;  %v1707_v35 = vpop.f32.mrf.mxu0 }
 0x12b   :  { %2427 = vmatprep.subr.bf16.mxu0 %v3638_v38  ;;  %2469 = vmatpush1.bf16.msra.mxu1 %v3681_v44  ;;  %v1706_v38 = vadd.f32 %v1705_v31, %v330_v30  ;;  %v338_v30 = vrot.slane %v3930_v23, %v337_v26 }
 0x12c   :  { %2470 = vmatprep.subr.bf16.mxu1 %v3686_v43  ;;  %v3711_v43 = vld [vmem:[#allocation4 + $0x1a0] ss:$8 sps:$4 sm:$0xff]  }
 0x12d   :  { %v1749_v44 = vadd.f32 %v1748_v32, %v1706_v38 }
 0x12e   :  { %2428 = vmatpush1.bf16.msra.mxu0 %v3636_v21 }
 0x12f   :  { %2429 = vmatprep.subr.bf16.mxu0 %v3641_v9  ;;  %2471 = vmatpush1.bf16.msra.mxu1 %v3684_v46  ;;  %v1708_v9 = vadd.f32 %v1707_v35, %v334_v28 }
 0x130   :  { %2472 = vmatprep.subr.bf16.mxu1 %v3689_v48 }
 0x131   :  { %v1751_v48 = vadd.f32 %v1750_v36, %v1708_v9 }
 0x132   :  { %2430 = vmatpush1.bf16.msra.mxu0 %v3639_v39 }
 0x133   :  { %2431 = vmatprep.subr.bf16.mxu0 %v3644_v42  ;;  %2473 = vmatpush1.bf16.msra.mxu1 %v3687_v50  ;;  %v3713_v42 = vld [vmem:[#allocation4 + $0x1a4] ss:$8 sps:$4 sm:$0xff]  }
 0x134   :  { %2474 = vmatprep.subr.bf16.mxu1 %v3692_v52 }
 0x136   :  { %2432 = vmatpush1.bf16.msra.mxu0 %v3642_v41 }
 0x137   :  { %2433 = vmatprep.subr.bf16.mxu0 %v3647_v45  ;;  %2475 = vmatpush1.bf16.msra.mxu1 %v3690_v56 }
 0x138   :  { %2476 = vmatprep.subr.bf16.mxu1 %v3695_v58 }
 0x13a   :  { %2434 = vmatpush1.bf16.msra.mxu0 %v3645_v47 }
 0x13b   :  { %2435 = vmatprep.subr.bf16.mxu0 %v3650_v49  ;;  %2477 = vmatpush1.bf16.msra.mxu1 %v3693_v60 }
 0x13c   :  { %2478 = vmatprep.subr.bf16.mxu1 %v3698_v62  ;;  %v3719_v62 = vld [vmem:[#allocation4 + $0x184] ss:$8 sps:$4 sm:$0xff]  }
 0x13e   :  { %2436 = vmatpush2.bf16.msra.mxu0 %v3648_v51  ;;  %v3716_v51 = vld [vmem:[#allocation4 + $0x194] ss:$8 sps:$4 sm:$0xff]  }
 0x13f   :  { %2437 = vmatprep.subr.bf16.mxu0 %v3653_v54  ;;  %2479 = vmatpush2.bf16.msra.mxu1 %v3696_v0 }
 0x140   :  { %2480 = vmatprep.subr.bf16.mxu1 %v3701_v2 }
 0x142   :  { %2438 = vmatpush2.bf16.msra.mxu0 %v3651_v57  ;;  %v3714_v57 = vld [vmem:[#allocation4 + $0x190] ss:$8 sps:$4 sm:$0xff]  }
 0x143   :  { %2439 = vmatprep.subr.bf16.mxu0 %v3656_v59  ;;  %2481 = vmatpush2.bf16.msra.mxu1 %v3699_v4 }
 0x144   :  { %2482 = vmatprep.subr.bf16.mxu1 %v3704_v7  ;;  %v3722_v7 = vld [vmem:[%s4036_s5 + $0x70] sm:$0xff]  }
 0x146   :  { %2440 = vmatpush2.bf16.msra.mxu0 %v3654_v61 }
 0x147   :  { %2441 = vmatprep.subr.bf16.mxu0 %v3659_v63  ;;  %2483 = vmatpush2.bf16.msra.mxu1 %v3702_v11  ;;  %v3724_v11 = vld [vmem:[%s4036_s5 + $0x68] sm:$0xff]  }
 0x148   :  { %2484 = vmatprep.subr.bf16.mxu1 %v3707_v14  ;;  %v3726_v14 = vld [vmem:[%s4036_s5 + $0x60] sm:$0xff]  }
 0x14a   :  { %2442 = vmatpush2.bf16.msra.mxu0 %v3657_v1  ;;  %v3717_v1 = vld [vmem:[#allocation4 + $0x180] ss:$8 sps:$4 sm:$0xff]  }
 0x14b   :  { %2443 = vmatprep.subr.bf16.mxu0 %v3662_v3  ;;  %2485 = vmatpush2.bf16.msra.mxu1 %v3705_v18 }
 0x14c   :  { %2486 = vmatprep.subr.bf16.mxu1 %v3710_v37 }
 0x14e   :  { %2444 = vmatpush2.bf16.msra.mxu0 %v3660_v6  ;;  %v3721_v6 = vld [vmem:[%s4036_s5 + $0x38] sm:$0xff]  }
 0x14f   :  { %2445 = vmatprep.subr.bf16.mxu0 %v3665_v10  ;;  %2487 = vmatpush2.bf16.msra.mxu1 %v3708_v8  ;;  %v3723_v10 = vld [vmem:[%s4036_s5 + $0x30] sm:$0xff]  }
 0x150   :  { %2488 = vmatprep.subr.bf16.mxu1 %v3713_v42 }
 0x152   :  { %2446 = vmatpush2.bf16.msra.mxu0 %v3663_v13  ;;  %v3725_v13 = vld [vmem:[%s4036_s5 + $0x28] sm:$0xff]  }
 0x153   :  { %2447 = vmatprep.subr.bf16.mxu0 %v3668_v17  ;;  %2489 = vmatpush2.bf16.msra.mxu1 %v3711_v43  ;;  %v3729_v17 = vld [vmem:[%s4036_s5 + $0x18] sm:$0xff]  }
 0x154   :  { %2490 = vmatprep.subr.bf16.mxu1 %v3716_v51 }
 0x156   :  { %2448 = vmatpush2.bf16.msra.mxu0 %v3666_v22 }
 0x157   :  { %2449 = vmatprep.subr.bf16.mxu0 %v3671_v27  ;;  %2491 = vmatpush2.bf16.msra.mxu1 %v3714_v57 }
 0x158   :  { %2492 = vmatprep.subr.bf16.mxu1 %v3719_v62  ;;  %v3732_v62 = vld [vmem:[%s4036_s5 + $0x48] sm:$0xff]  }
 0x15a   :  { %2450 = vmatpush2.bf16.msra.mxu0 %v3669_v29  ;;  %v342_v29 = vrot.slane %v3930_v23, %v341_v25 }
 0x15b   :  { %2493 = vmatpush2.bf16.msra.mxu1 %v3717_v1  ;;  %3181 = vmatprep.subr.bf16.mxu0 %v3720_v5  ;;  %v3735_v1 = vld [vmem:[%s4036_s5] sm:$0xff]   ;;  %v3738_v5 = vld [vmem:[%s4038_s7 + $0x28] sm:$0xff]  }
 0x15d   :  { %v1787_v20 = vpop.f32.mrf.mxu0 }
 0x15e   :  { %v1830_v21 = vpop.f32.mrf.mxu1  ;;  %v1788_v45 = vadd.f32 %v1787_v20, %v1745_v55 }
 0x15f   :  { %v1789_v39 = vpop.f32.mrf.mxu0 }
 0x160   :  { %v1832_v40 = vpop.f32.mrf.mxu1  ;;  %v1790_v41 = vadd.f32 %v1789_v39, %v1747_v53  ;;  %v1831_v58 = vadd.f32 %v1830_v21, %v1788_v45 }
 0x161   :  { %v1791_v46 = vpop.f32.mrf.mxu0 }
 0x162   :  { %v1834_v47 = vpop.f32.mrf.mxu1  ;;  %v1792_v49 = vadd.f32 %v1791_v46, %v1749_v44  ;;  %v1833_v52 = vadd.f32 %v1832_v40, %v1790_v41  ;;  %v2011_v2 = vmax.f32 %v1831_v58, 0.0 }
 0x163   :  { %v1793_v50 = vpop.f32.mrf.mxu0 }
 0x164   :  { %v1835_v54 = vadd.f32 %v1834_v47, %v1792_v49  ;;  %v1794_v56 = vadd.f32 %v1793_v50, %v1751_v48  ;;  %v1836_v59 = vpop.f32.mrf.mxu1  ;;  %v2012_v63 = vmax.f32 %v1833_v52, 0.0 }
 0x166   :  { %v1837_v60 = vadd.f32 %v1836_v59, %v1794_v56  ;;  %v2015_v61 = vmax.f32 %v1835_v54, 0.0 }
 0x168   :  { %v2016_v0 = vmax.f32 %v1837_v60, 0.0  ;;  %v2019_v4 = vpack.c.bf16 %v2015_v61, %v2011_v2  ;;  %v3730_v60 = vld [vmem:[%s4036_s5 + $0x50] sm:$0xff]   ;;  %v3736_v2 = vld [vmem:[%s4038_s7 + $0x38] sm:$0xff]  }
 0x169   :  { %v3731_v61 = vld [vmem:[%s4036_s5 + $0x10] sm:$0xff]  }
 0x16a   :  { %v2020_v3 = vpack.c.bf16 %v2016_v0, %v2012_v63  ;;  %v3733_v63 = vld [vmem:[%s4036_s5 + $0x8] sm:$0xff]   ;;  %v3734_v0 = vld [vmem:[%s4036_s5 + $0x40] sm:$0xff]  }
 0x16c   :  { %2451 = vmatprep.mubr.bf16.mxu0 %v2020_v3  ;;  %v3794_v3 = vmov 0.0  }
 0x16d   :  { %2452 = vmatmul.mubr.bf16.vlgmr.msra.gmra.mxu0 %v2019_v4  ;;  %3212 = vmatprep.subr.bf16.mxu1 %v3794_v3  ;;  %v3737_v4 = vld [vmem:[%s4038_s7 + $0x30] sm:$0xff]  }
 0x16e   :  { %3182 = vmatpush3.bf16.msra.mxu0 %v3721_v6  ;;  %v3739_v6 = vld [vmem:[%s4038_s7 + $0x20] sm:$0xff]  }
 0x16f   :  { %3183 = vmatprep.subr.bf16.mxu0 %v3722_v7 }
 0x172   :  { %3184 = vmatpush3.bf16.msra.mxu0 %v3723_v10 }
 0x173   :  { %3185 = vmatprep.subr.bf16.mxu0 %v3724_v11  ;;  %v2087_v11 = vld [vmem:[%s4035_s4] sm:$0x3] }
 0x176   :  { %3186 = vmatpush3.bf16.msra.mxu0 %v3725_v13 }
 0x177   :  { %3187 = vmatprep.subr.bf16.mxu0 %v3726_v14  ;;  %v2096_v14 = vrot.slane %v2087_v11, %v333_v19 }
 0x17a   :  { %3188 = vmatpush3.bf16.msra.mxu0 %v3727_v15  ;;  %v2092_v15 = vrot.slane %v2087_v11, %v329_v24  ;;  %v3740_v24 = vld [vmem:[%s4038_s7 + $0x18] sm:$0xff]  }
 0x17b   :  { %3189 = vmatprep.subr.bf16.mxu0 %v3728_v16 }
 0x17e   :  { %3190 = vmatpush3.bf16.msra.mxu0 %v3729_v17 }
 0x17f   :  { %3191 = vmatprep.subr.bf16.mxu0 %v3730_v60 }
 0x182   :  { %3192 = vmatpush3.bf16.msra.mxu0 %v3731_v61 }
 0x183   :  { %3193 = vmatprep.subr.bf16.mxu0 %v3732_v62 }
 0x186   :  { %3194 = vmatpush3.bf16.msra.mxu0 %v3733_v63 }
 0x187   :  { %3195 = vmatprep.subr.bf16.mxu0 %v3734_v0 }
 0x18a   :  { %3196 = vmatpush3.bf16.msra.mxu0 %v3735_v1 }
 0x19d   :  { %v1873_v18 = vpop.f32.mrf.mxu0 }
 0x19e   :  { %v1916_v22 = vpop.f32.mrf.mxu1  ;;  %v1874_v34 = vadd.f32 %v1873_v18, %v338_v30 }
 0x19f   :  { %v1875_v27 = vpop.f32.mrf.mxu0 }
 0x1a0   :  { %v1918_v28 = vpop.f32.mrf.mxu1  ;;  %v1876_v33 = vadd.f32 %v1875_v27, %v342_v29  ;;  %v1917_v53 = vadd.f32 %v1916_v22, %v1874_v34 }
 0x1a1   :  { %v1877_v31 = vpop.f32.mrf.mxu0 }
 0x1a2   :  { %v1920_v32 = vpop.f32.mrf.mxu1  ;;  %v1878_v37 = vadd.f32 %v1877_v31, %v338_v30  ;;  %v1919_v20 = vadd.f32 %v1918_v28, %v1876_v33 }
 0x1a3   :  { %v1879_v35 = vpop.f32.mrf.mxu0 }
 0x1a4   :  { %v1922_v36 = vpop.f32.mrf.mxu1  ;;  %v1880_v21 = vadd.f32 %v1879_v35, %v342_v29  ;;  %v1921_v39 = vadd.f32 %v1920_v32, %v1878_v37 }
 0x1a6   :  { %v1923_v23 = vadd.f32 %v1922_v36, %v1880_v21 }
 0x1dd   :  { %v1959_v38 = vpop.f32.mrf.mxu0 }
 0x1de   :  { %v2002_v8 = vpop.f32.mrf.mxu1  ;;  %v1960_v42 = vadd.f32 %v1959_v38, %v1917_v53  ;;  %v3741_v38 = vld [vmem:[%s4038_s7 + $0x10] sm:$0xff]  }
 0x1df   :  { %v1961_v9 = vpop.f32.mrf.mxu0 }
 0x1e0   :  { %v2004_v55 = vpop.f32.mrf.mxu1  ;;  %v1962_v40 = vadd.f32 %v1961_v9, %v1919_v20  ;;  %v2003_v49 = vadd.f32 %v2002_v8, %v1960_v42  ;;  %v3742_v8 = vld [vmem:[%s4038_s7 + $0x8] sm:$0xff]   ;;  %v3743_v20 = vld [vmem:[%s4038_s7] sm:$0xff]  }
 0x1e1   :  { %v1963_v44 = vpop.f32.mrf.mxu0 }
 0x1e2   :  { %v2006_v41 = vpop.f32.mrf.mxu1  ;;  %v1964_v43 = vadd.f32 %v1963_v44, %v1921_v39  ;;  %v2005_v46 = vadd.f32 %v2004_v55, %v1962_v40  ;;  %v2013_v57 = vmax.f32 %v2003_v49, 0.0  ;;  %v3146_v55 = vld [vmem:[%s4037_s6] ss:$0 sm:$0xff] }
 0x1e3   :  { %v1965_v45 = vpop.f32.mrf.mxu0 }
 0x1e4   :  { %v2007_v47 = vadd.f32 %v2006_v41, %v1964_v43  ;;  %v1966_v48 = vadd.f32 %v1965_v45, %v1923_v23  ;;  %v2008_v50 = vpop.f32.mrf.mxu1  ;;  %v2014_v54 = vmax.f32 %v2005_v46, 0.0 }
 0x1e6   :  { %v2009_v51 = vadd.f32 %v2008_v50, %v1966_v48  ;;  %v2017_v52 = vmax.f32 %v2007_v47, 0.0  ;;  %v3163_v47 = vld [vmem:[%s4039_s8] ss:$0 sm:$0xff] }
 0x1e8   :  { %v2018_v56 = vmax.f32 %v2009_v51, 0.0  ;;  %v2021_v59 = vpack.c.bf16 %v2017_v52, %v2013_v57 }
 0x1ea   :  { %v2022_v58 = vpack.c.bf16 %v2018_v56, %v2014_v54 }
 0x1ec   :  { %2494 = vmatprep.mubr.bf16.mxu1 %v2022_v58 }
 0x1ed   :  { %2495 = vmatmul.mubr.bf16.vlgmr.msra.gmra.mxu1 %v2021_v59 }
 0x1ee   :  { %3213 = vmatpush3.bf16.msra.mxu1 %v3736_v2  ;;  %3228 = vmatprep.mubr.msk.bf16.mxu1 %vm3795_vm0, %v3794_v3 }
 0x1ef   :  { %3214 = vmatprep.subr.bf16.mxu1 %v3794_v3 }
 0x1f2   :  { %3215 = vmatpush3.bf16.msra.mxu1 %v3737_v4 }
 0x1f3   :  { %3216 = vmatprep.subr.bf16.mxu1 %v3794_v3 }
 0x1f6   :  { %3217 = vmatpush3.bf16.msra.mxu1 %v3738_v5 }
 0x1f7   :  { %3218 = vmatprep.subr.bf16.mxu1 %v3794_v3 }
 0x1fa   :  { %3219 = vmatpush3.bf16.msra.mxu1 %v3739_v6 }
 0x1fb   :  { %3220 = vmatprep.subr.bf16.mxu1 %v3794_v3 }
 0x1fe   :  { %3221 = vmatpush3.bf16.msra.mxu1 %v3740_v24 }
 0x1ff   :  { %3222 = vmatprep.subr.bf16.mxu1 %v3794_v3 }
 0x202   :  { %3223 = vmatpush3.bf16.msra.mxu1 %v3741_v38 }
 0x203   :  { %3224 = vmatprep.subr.bf16.mxu1 %v3794_v3 }
 0x206   :  { %3225 = vmatpush3.bf16.msra.mxu1 %v3742_v8 }
 0x207   :  { %3226 = vmatprep.subr.bf16.mxu1 %v3794_v3 }
 0x20a   :  { %3227 = vmatpush3.bf16.msra.mxu1 %v3743_v20 }
 0x22d   :  { %v2453_v7 = vpop.f32.mrf.mxu0 }
 0x22e   :  { %v2454_v26 = vadd.f32 %v2453_v7, %v2092_v15 }
 0x22f   :  { %v2455_v10 = vpop.f32.mrf.mxu0 }
 0x230   :  { %v2456_v22 = vadd.f32 %v2455_v10, %v2096_v14 }
 0x231   :  { %v2457_v13 = vpop.f32.mrf.mxu0 }
 0x232   :  { %v2458_v25 = vadd.f32 %v2457_v13, %v2092_v15 }
 0x233   :  { %v2459_v17 = vpop.f32.mrf.mxu0 }
 0x234   :  { %v2460_v28 = vadd.f32 %v2459_v17, %v2096_v14 }
 0x2ad   :  { %v2496_v16 = vpop.f32.mrf.mxu1 }
 0x2ae   :  { %v2497_v31 = vadd.f32 %v2496_v16, %v2454_v26 }
 0x2af   :  { %v2498_v18 = vpop.f32.mrf.mxu1 }
 0x2b0   :  { %v2499_v29 = vadd.f32 %v2498_v18, %v2456_v22  ;;  %v2505_v19 = vmax.f32 %v2497_v31, 0.0 }
 0x2b1   :  { %v2500_v27 = vpop.f32.mrf.mxu1 }
 0x2b2   :  { %v2501_v30 = vadd.f32 %v2500_v27, %v2458_v25  ;;  %v2506_v35 = vmax.f32 %v2499_v29, 0.0 }
 0x2b3   :  { %v2502_v32 = vpop.f32.mrf.mxu1 }
 0x2b4   :  { %v2503_v33 = vadd.f32 %v2502_v32, %v2460_v28  ;;  %v2507_v34 = vmax.f32 %v2501_v30, 0.0 }
 0x2b6   :  { %v2508_v36 = vmax.f32 %v2503_v33, 0.0  ;;  %v2509_v12 = vpack.c.bf16 %v2507_v34, %v2505_v19 }
 0x2b8   :  { %v2510_v37 = vpack.c.bf16 %v2508_v36, %v2506_v35 }
 0x2ba   :  { %2678 = vmatprep.mubr.bf16.mxu0 %v2510_v37 }
 0x2bb   :  { %2679 = vmatmul.mubr.bf16.vlgmr.msra.gmra.mxu0 %v2509_v12 }
 0x37b   :  { %v3197_v21 = vpop.f32.mrf.mxu0 }
 0x37d   :  { %v3198_v53 = vpop.f32.mrf.mxu0 }
 0x37e   :  { %v3199_v9 = vadd.f32 %v3198_v53, %v3197_v21 }
 0x37f   :  { %v3200_v39 = vpop.f32.mrf.mxu0 }
 0x380   :  { %v2681_v42 = vadd.f32 %v3199_v9, %v3146_v55 }
 0x381   :  { %v3201_v40 = vpop.f32.mrf.mxu0 }
 0x382   :  { %v3202_v44 = vadd.f32 %v3201_v40, %v3200_v39  ;;  %v2687_v23 = vmax.f32 %v2681_v42, 0.0 }
 0x384   :  { %v2684_v41 = vadd.f32 %v3202_v44, %v3146_v55 }
 0x386   :  { %v2688_v43 = vmax.f32 %v2684_v41, 0.0 }
 0x388   :  { %v2689_v45 = vpack.c.bf16 %v2688_v43, %v2687_v23 }
 0x38a   :  { %3229 = vmatmul.mubr.bf16.vlgmr.msra.gmra.mxu1 %v2689_v45 }
 0x44a   :  { %v2795_v46 = vpop.f32.mrf.mxu1 }
 0x44b   :  { %v2796_v50 = vadd.f32 %v3163_v47, %v2795_v46 }
 0x44c   :  { %v3230_v48 = vpop.f32.mrf.mxu1 }
 0x44e   :  { %v2798_v49 = vpop.f32.mrf.mxu1 }
 0x44f   :  { %v2799_v51 = vadd.f32 %v3163_v47, %v2798_v49 }
 0x450   :  { %v3231_v52 = vpop.f32.mrf.mxu1 }
 0x451   :  { %v3179_v54 = vpack.c.bf16 %v2799_v51, %v2796_v50 }
 0x453   :  { %3180 = vst [vmem:[%s4040_s9] sm:$0xff] %v3179_v54  }
 0x454   :  { %2816 = vsyncpa [#allocation3], 1 }
 0x455   :  { %2817 = vsyncpa [#allocation5], 1 }

</bundles_post_ra>
